<compile_context>
chip_gen: v5e
topology: v5e:2x2
jax: 0.10.0
libtpu: 0.0.40
codegen_flags: <defaults>
</compile_context>

<pallas_src>
import jax
import jax.numpy as jnp
from jax.experimental import pallas as pl
from jax.experimental.pallas import tpu as pltpu

_LANE = 128
_SUBLANE = 8


def _round_up(x, m):
    return ((x + m - 1) // m) * m


def _mlp_kernel(obs_ref, goal_ref, w1s_ref, w1g_ref, b1_ref,
                w2_ref, b2_ref, w3_ref, b3_ref, o_ref):
    """logits = relu(relu([obs||goal]@W1+b1)@W2+b2)@W3+b3 (concat fused)."""
    cdt = w2_ref.dtype  # MXU compute dtype (bf16 or f32); accumulation is f32.

    # Layer 1: two partial matmuls replace the obs||goal concatenate.
    # TODO(synk): for tiny Ds/Dg this under-fills the MXU K-dim; packing a
    # single (TB, Ds+Dg) operand would shave layer-1 push count, but layer 1 is
    # a negligible share of the FLOPs here.
    h1 = jnp.dot(obs_ref[...], w1s_ref[...], preferred_element_type=jnp.float32)
    h1 = h1 + jnp.dot(goal_ref[...], w1g_ref[...],
                      preferred_element_type=jnp.float32)
    h1 = jnp.maximum(h1 + b1_ref[...].astype(jnp.float32), 0.0).astype(cdt)

    h2 = jnp.dot(h1, w2_ref[...], preferred_element_type=jnp.float32)
    h2 = jnp.maximum(h2 + b2_ref[...].astype(jnp.float32), 0.0).astype(cdt)

    out = jnp.dot(h2, w3_ref[...], preferred_element_type=jnp.float32)
    out = out + b3_ref[...].astype(jnp.float32)
    o_ref[...] = out.astype(o_ref.dtype)  # lane-dense (TB, A_pad) store


def _default_vmem_limit():
    # v5e/v6e have 128 MiB VMEM per core, v7x only 64 MiB; leave headroom.
    try:
        cap = pltpu.get_tpu_info().vmem_capacity_bytes
    except Exception:
        cap = 64 * 1024 * 1024
    return int(max(32 << 20, min(cap - (16 << 20), 100 << 20)))


def _const_spec(shape, single_buffer):
    """BlockSpec for a VMEM-resident operand (same block every grid step)."""
    if single_buffer:
        try:
            return pl.BlockSpec(shape, lambda i: (0, 0),
                                pipeline_mode=pl.Buffered(1))
        except TypeError:
            pass  # older jax without pipeline_mode kwarg
    return pl.BlockSpec(shape, lambda i: (0, 0))


def goal_policy_forward(obs, goal, params, *, batch_tile=512, out_dtype=None):
    """Forward pass of DiscreteStochasticGoalPolicy (logits over actions)."""
    w1s, w1g, b1, w2, b2, w3p, b3p, n_actions = params
    H1, H2, A_pad = w1s.shape[1], w2.shape[1], w3p.shape[1]
    compute_dtype = w1s.dtype
    if out_dtype is None:
        out_dtype = compute_dtype

    B = obs.shape[0]
    # Glue: Flatten() embeddings.  Activations are cast to the *weight* dtype
    # so bf16 params actually run bf16 on the MXU (f32 accumulation in-kernel).
    state = obs.reshape(B, -1).astype(compute_dtype)
    g = goal.reshape(B, -1).astype(compute_dtype)
    Ds, Dg = state.shape[1], g.shape[1]

    # Batch tile: >=2 grid steps whenever B allows (megacore sharding on v7x),
    # capped at batch_tile.  No wrapper-side padding: the ragged last block's
    # out-of-bounds rows are never stored, and only valid rows are returned.
    TB = max(_SUBLANE, min(batch_tile, _round_up(pl.cdiv(B, 2), _SUBLANE)))
    grid = (pl.cdiv(B, TB),)

    act_bytes = jnp.dtype(compute_dtype).itemsize
    out_bytes = jnp.dtype(out_dtype).itemsize
    w_bytes = jnp.dtype(w2.dtype).itemsize
    n_weight = Ds * H1 + Dg * H1 + H1 * H2 + H2 * A_pad
    flops = 2 * B * n_weight
    bytes_accessed = (act_bytes * B * (Ds + Dg) + out_bytes * B * A_pad
                      + w_bytes * n_weight + 4 * (H1 + H2 + A_pad))

    def run(single_buffer_weights):
        # TODO(synk): if H1/H2 grow to e.g. 4096, add an "arbitrary" grid axis
        # tiling W2/W3 columns so the resident weights fit v7x's 64 MiB VMEM.
        in_specs = [
            pl.BlockSpec((TB, Ds), lambda i: (i, 0)),              # obs tile
            pl.BlockSpec((TB, Dg), lambda i: (i, 0)),              # goal tile
            _const_spec((Ds, H1), single_buffer_weights),          # W1_obs
            _const_spec((Dg, H1), single_buffer_weights),          # W1_goal
            _const_spec((1, H1), single_buffer_weights),           # b1
            _const_spec((H1, H2), single_buffer_weights),          # W2
            _const_spec((1, H2), single_buffer_weights),           # b2
            _const_spec((H2, A_pad), single_buffer_weights),       # W3 (padded)
            _const_spec((1, A_pad), single_buffer_weights),        # b3 (padded)
        ]
        return pl.pallas_call(
            _mlp_kernel,
            out_shape=jax.ShapeDtypeStruct((B, A_pad), out_dtype),
            grid=grid,
            in_specs=in_specs,
            out_specs=pl.BlockSpec((TB, A_pad), lambda i: (i, 0)),
            compiler_params=pltpu.CompilerParams(
                dimension_semantics=("parallel",),        # megacore shard
                vmem_limit_bytes=_default_vmem_limit(),
            ),
            cost_estimate=pl.CostEstimate(
                flops=flops, transcendentals=0, bytes_accessed=bytes_accessed),
        )(state, g, w1s, w1g, b1, w2, b2, w3p, b3p)

    try:
        out = run(True)
    except Exception:
        # pipeline_mode=pl.Buffered(1) not supported on this jax build:
        # fall back to default (double-buffered) resident weights.
        out = run(False)

    # Strip the lane padding of the logits dimension.
    return out[:, :n_actions]


def init_params(key, ds, dg, hidden, n_actions, dtype=jnp.float32):
    """Torch-nn.Linear-style init; returns (kernel params, reference params)."""
    dims = [ds + dg, hidden[0], hidden[1], n_actions]
    raw = []
    for i in range(3):
        fan_in, fan_out = dims[i], dims[i + 1]
        key, kw, kb = jax.random.split(key, 3)
        bound = 1.0 / jnp.sqrt(jnp.float32(fan_in))
        w = jax.random.uniform(kw, (fan_in, fan_out), jnp.float32, -bound, bound)
        b = jax.random.uniform(kb, (1, fan_out), jnp.float32, -bound, bound)
        raw += [w, b]
    w1, b1, w2, b2, w3, b3 = raw

    # Split W1 so the kernel fuses the obs/goal concat as two partial matmuls.
    w1s, w1g = w1[:ds], w1[ds:]
    # Pad logits dim to a full 128-lane vreg for unmasked (lane-dense) stores.
    a_pad = _round_up(max(n_actions, _LANE), _LANE)
    w3p = jnp.zeros((dims[2], a_pad), jnp.float32).at[:, :n_actions].set(w3)
    b3p = jnp.zeros((1, a_pad), jnp.float32).at[:, :n_actions].set(b3)

    # Weights carry the compute dtype (bf16 for the fast MXU path); biases stay
    # f32 (added to the f32 accumulator, negligible bytes).
    kernel_params = (w1s.astype(dtype), w1g.astype(dtype), b1,
                     w2.astype(dtype), b2, w3p.astype(dtype), b3p)
    return kernel_params + (n_actions,), (w1, b1, w2, b2, w3, b3)


def _reference_forward(obs, goal, raw_params):
    B = obs.shape[0]
    x = jnp.concatenate([obs.reshape(B, -1), goal.reshape(B, -1)], axis=1)
    w1, b1, w2, b2, w3, b3 = raw_params
    h1 = jnp.maximum(x @ w1 + b1, 0.0)
    h2 = jnp.maximum(h1 @ w2 + b2, 0.0)
    return h2 @ w3 + b3


if __name__ == "__main__":
    key = jax.random.PRNGKey(0)
    k_obs, k_goal, k_params = jax.random.split(key, 3)

    # Small env-like shapes: observation_space = goal_space = (1, 4, 4) images,
    # action_space.n = 8, hidden layers [256, 256].  B=24 exercises the
    # multi-step grid and the ragged (masked) last batch block.
    B, C, H, W = 24, 1, 4, 4
    n_actions = 8
    hidden = (256, 256)

    obs = jax.random.normal(k_obs, (B, C, H, W), jnp.float32)    # NCHW
    goal = jax.random.normal(k_goal, (B, C, H, W), jnp.float32)  # NCHW
    ds = dg = C * H * W

    # f32 params: strict numerical check against the plain-JAX reference.
    params_f32, raw_params = init_params(k_params, ds, dg, hidden, n_actions,
                                         dtype=jnp.float32)
    logits = jax.block_until_ready(goal_policy_forward(obs, goal, params_f32))
    ref = _reference_forward(obs, goal, raw_params)
    assert logits.shape == (B, n_actions)
    assert jnp.allclose(logits, ref, atol=1e-4, rtol=1e-4), "f32 mismatch vs ref"

    # bf16 params: exercise the native-bf16 MXU path (loose tolerance).
    params_bf16, _ = init_params(k_params, ds, dg, hidden, n_actions,
                                 dtype=jnp.bfloat16)
    logits_bf16 = jax.block_until_ready(
        goal_policy_forward(obs, goal, params_bf16, out_dtype=jnp.float32))
    assert logits_bf16.shape == (B, n_actions)
    assert bool(jnp.all(jnp.isfinite(logits_bf16)))
    assert float(jnp.max(jnp.abs(logits_bf16 - ref))) < 0.1, "bf16 mismatch vs ref"

    # TODO(synk): act_vectorized sampling / softmax / nll / entropy heads stay
    # in plain JAX downstream of these logits.
    print("KERNEL_OK")
</pallas_src>

<mosaic_0001>
module attributes {stable_mosaic.version = 11 : i64} {
  func.func @_mlp_kernel(%arg0: i32, %arg1: memref<16x16xf32, #tpu.memory_space<vmem>>, %arg2: memref<16x16xf32, #tpu.memory_space<vmem>>, %arg3: memref<16x256xf32, #tpu.memory_space<vmem>>, %arg4: memref<16x256xf32, #tpu.memory_space<vmem>>, %arg5: memref<1x256xf32, #tpu.memory_space<vmem>>, %arg6: memref<256x256xf32, #tpu.memory_space<vmem>>, %arg7: memref<1x256xf32, #tpu.memory_space<vmem>>, %arg8: memref<256x128xf32, #tpu.memory_space<vmem>>, %arg9: memref<1x128xf32, #tpu.memory_space<vmem>>, %arg10: memref<16x128xf32, #tpu.memory_space<vmem>>) attributes {dimension_semantics = [#tpu.dimension_semantics<parallel>], iteration_bounds = array<i64: 2>, scalar_prefetch = 0 : i64, scratch_operands = 0 : i64, tpu.core_type = #tpu.core_type<tc>, window_params = [{transform_indices = @transform_0, window_bounds = array<i64: 16, 16>}, {transform_indices = @transform_1, window_bounds = array<i64: 16, 16>}, {pipeline_mode = #tpu.pipeline_mode<synchronous>, transform_indices = @transform_2, window_bounds = array<i64: 16, 256>}, {pipeline_mode = #tpu.pipeline_mode<synchronous>, transform_indices = @transform_3, window_bounds = array<i64: 16, 256>}, {pipeline_mode = #tpu.pipeline_mode<synchronous>, transform_indices = @transform_4, window_bounds = array<i64: 1, 256>}, {pipeline_mode = #tpu.pipeline_mode<synchronous>, transform_indices = @transform_5, window_bounds = array<i64: 256, 256>}, {pipeline_mode = #tpu.pipeline_mode<synchronous>, transform_indices = @transform_6, window_bounds = array<i64: 1, 256>}, {pipeline_mode = #tpu.pipeline_mode<synchronous>, transform_indices = @transform_7, window_bounds = array<i64: 256, 128>}, {pipeline_mode = #tpu.pipeline_mode<synchronous>, transform_indices = @transform_8, window_bounds = array<i64: 1, 128>}, {transform_indices = @transform_9, window_bounds = array<i64: 16, 128>}]} {
    %c0 = arith.constant 0 : index
    %c0_0 = arith.constant 0 : index
    %0 = vector.load %arg1[%c0, %c0_0] : memref<16x16xf32, #tpu.memory_space<vmem>>, vector<16x16xf32>
    %c0_1 = arith.constant 0 : index
    %c0_2 = arith.constant 0 : index
    %1 = vector.load %arg3[%c0_1, %c0_2] : memref<16x256xf32, #tpu.memory_space<vmem>>, vector<16x256xf32>
    %cst = arith.constant dense<0.000000e+00> : vector<16x256xf32>
    %2 = tpu.matmul %0, %1, %cst {dimension_numbers = #tpu.dot_dimension_numbers<[1], [0], [0], [1], [0, 0, 1, 1], [], []>} : vector<16x16xf32>, vector<16x256xf32>, vector<16x256xf32> -> vector<16x256xf32>
    %c0_3 = arith.constant 0 : index
    %c0_4 = arith.constant 0 : index
    %3 = vector.load %arg2[%c0_3, %c0_4] : memref<16x16xf32, #tpu.memory_space<vmem>>, vector<16x16xf32>
    %c0_5 = arith.constant 0 : index
    %c0_6 = arith.constant 0 : index
    %4 = vector.load %arg4[%c0_5, %c0_6] : memref<16x256xf32, #tpu.memory_space<vmem>>, vector<16x256xf32>
    %cst_7 = arith.constant dense<0.000000e+00> : vector<16x256xf32>
    %5 = tpu.matmul %3, %4, %cst_7 {dimension_numbers = #tpu.dot_dimension_numbers<[1], [0], [0], [1], [0, 0, 1, 1], [], []>} : vector<16x16xf32>, vector<16x256xf32>, vector<16x256xf32> -> vector<16x256xf32>
    %6 = arith.addf %2, %5 : vector<16x256xf32>
    %c0_8 = arith.constant 0 : index
    %c0_9 = arith.constant 0 : index
    %7 = vector.load %arg5[%c0_8, %c0_9] : memref<1x256xf32, #tpu.memory_space<vmem>>, vector<1x256xf32>
    %8 = vector.broadcast %7 : vector<1x256xf32> to vector<16x256xf32>
    %9 = arith.addf %6, %8 : vector<16x256xf32>
    %cst_10 = arith.constant 0.000000e+00 : f32
    %10 = vector.broadcast %cst_10 : f32 to vector<16x256xf32>
    %11 = arith.maximumf %9, %10 : vector<16x256xf32>
    %c0_11 = arith.constant 0 : index
    %c0_12 = arith.constant 0 : index
    %12 = vector.load %arg6[%c0_11, %c0_12] : memref<256x256xf32, #tpu.memory_space<vmem>>, vector<256x256xf32>
    %cst_13 = arith.constant dense<0.000000e+00> : vector<16x256xf32>
    %13 = tpu.matmul %11, %12, %cst_13 {dimension_numbers = #tpu.dot_dimension_numbers<[1], [0], [0], [1], [0, 0, 1, 1], [], []>} : vector<16x256xf32>, vector<256x256xf32>, vector<16x256xf32> -> vector<16x256xf32>
    %c0_14 = arith.constant 0 : index
    %c0_15 = arith.constant 0 : index
    %14 = vector.load %arg7[%c0_14, %c0_15] : memref<1x256xf32, #tpu.memory_space<vmem>>, vector<1x256xf32>
    %15 = vector.broadcast %14 : vector<1x256xf32> to vector<16x256xf32>
    %16 = arith.addf %13, %15 : vector<16x256xf32>
    %cst_16 = arith.constant 0.000000e+00 : f32
    %17 = vector.broadcast %cst_16 : f32 to vector<16x256xf32>
    %18 = arith.maximumf %16, %17 : vector<16x256xf32>
    %c0_17 = arith.constant 0 : index
    %c0_18 = arith.constant 0 : index
    %19 = vector.load %arg8[%c0_17, %c0_18] : memref<256x128xf32, #tpu.memory_space<vmem>>, vector<256x128xf32>
    %cst_19 = arith.constant dense<0.000000e+00> : vector<16x128xf32>
    %20 = tpu.matmul %18, %19, %cst_19 {dimension_numbers = #tpu.dot_dimension_numbers<[1], [0], [0], [1], [0, 0, 1, 1], [], []>} : vector<16x256xf32>, vector<256x128xf32>, vector<16x128xf32> -> vector<16x128xf32>
    %c0_20 = arith.constant 0 : index
    %c0_21 = arith.constant 0 : index
    %21 = vector.load %arg9[%c0_20, %c0_21] : memref<1x128xf32, #tpu.memory_space<vmem>>, vector<1x128xf32>
    %22 = vector.broadcast %21 : vector<1x128xf32> to vector<16x128xf32>
    %23 = arith.addf %20, %22 : vector<16x128xf32>
    %c0_22 = arith.constant 0 : index
    %c0_23 = arith.constant 0 : index
    %24 = vector.load %arg10[%c0_22, %c0_23] : memref<16x128xf32, #tpu.memory_space<vmem>>, vector<16x128xf32>
    tpu.vector_store %arg10[%c0_22, %c0_23], %23 {strides = array<i32>} : memref<16x128xf32, #tpu.memory_space<vmem>>, vector<16x128xf32>,
    return
  }
  func.func @transform_0(%arg0: i32) -> (i32, i32) {
    %c0_i32 = arith.constant 0 : i32
    %c0_i32_0 = arith.constant 0 : i32
    return %arg0, %c0_i32 : i32, i32
  }
  func.func @transform_1(%arg0: i32) -> (i32, i32) {
    %c0_i32 = arith.constant 0 : i32
    %c0_i32_0 = arith.constant 0 : i32
    return %arg0, %c0_i32 : i32, i32
  }
  func.func @transform_2(%arg0: i32) -> (i32, i32) {
    %c0_i32 = arith.constant 0 : i32
    %c0_i32_0 = arith.constant 0 : i32
    %c0_i32_1 = arith.constant 0 : i32
    return %c0_i32, %c0_i32_0 : i32, i32
  }
  func.func @transform_3(%arg0: i32) -> (i32, i32) {
    %c0_i32 = arith.constant 0 : i32
    %c0_i32_0 = arith.constant 0 : i32
    %c0_i32_1 = arith.constant 0 : i32
    return %c0_i32, %c0_i32_0 : i32, i32
  }
  func.func @transform_4(%arg0: i32) -> (i32, i32) {
    %c0_i32 = arith.constant 0 : i32
    %c0_i32_0 = arith.constant 0 : i32
    %c0_i32_1 = arith.constant 0 : i32
    return %c0_i32, %c0_i32_0 : i32, i32
  }
  func.func @transform_5(%arg0: i32) -> (i32, i32) {
    %c0_i32 = arith.constant 0 : i32
    %c0_i32_0 = arith.constant 0 : i32
    %c0_i32_1 = arith.constant 0 : i32
    return %c0_i32, %c0_i32_0 : i32, i32
  }
  func.func @transform_6(%arg0: i32) -> (i32, i32) {
    %c0_i32 = arith.constant 0 : i32
    %c0_i32_0 = arith.constant 0 : i32
    %c0_i32_1 = arith.constant 0 : i32
    return %c0_i32, %c0_i32_0 : i32, i32
  }
  func.func @transform_7(%arg0: i32) -> (i32, i32) {
    %c0_i32 = arith.constant 0 : i32
    %c0_i32_0 = arith.constant 0 : i32
    %c0_i32_1 = arith.constant 0 : i32
    return %c0_i32, %c0_i32_0 : i32, i32
  }
  func.func @transform_8(%arg0: i32) -> (i32, i32) {
    %c0_i32 = arith.constant 0 : i32
    %c0_i32_0 = arith.constant 0 : i32
    %c0_i32_1 = arith.constant 0 : i32
    return %c0_i32, %c0_i32_0 : i32, i32
  }
  func.func @transform_9(%arg0: i32) -> (i32, i32) {
    %c0_i32 = arith.constant 0 : i32
    %c0_i32_0 = arith.constant 0 : i32
    return %arg0, %c0_i32 : i32, i32
  }
}

module attributes {stable_mosaic.version = 11 : i64} {
  func.func @_mlp_kernel(%arg0: i32, %arg1: memref<16x16xf32, #tpu.memory_space<vmem>>, %arg2: memref<16x16xf32, #tpu.memory_space<vmem>>, %arg3: memref<16x256xf32, #tpu.memory_space<vmem>>, %arg4: memref<16x256xf32, #tpu.memory_space<vmem>>, %arg5: memref<1x256xf32, #tpu.memory_space<vmem>>, %arg6: memref<256x256xf32, #tpu.memory_space<vmem>>, %arg7: memref<1x256xf32, #tpu.memory_space<vmem>>, %arg8: memref<256x128xf32, #tpu.memory_space<vmem>>, %arg9: memref<1x128xf32, #tpu.memory_space<vmem>>, %arg10: memref<16x128xf32, #tpu.memory_space<vmem>>) attributes {dimension_semantics = [#tpu.dimension_semantics<parallel>], iteration_bounds = array<i64: 2>, scalar_prefetch = 0 : i64, scratch_operands = 0 : i64, tpu.core_type = #tpu.core_type<tc>, window_params = [{transform_indices = @transform_0, window_bounds = array<i64: 16, 16>}, {transform_indices = @transform_1, window_bounds = array<i64: 16, 16>}, {pipeline_mode = #tpu.pipeline_mode<synchronous>, transform_indices = @transform_2, window_bounds = array<i64: 16, 256>}, {pipeline_mode = #tpu.pipeline_mode<synchronous>, transform_indices = @transform_3, window_bounds = array<i64: 16, 256>}, {pipeline_mode = #tpu.pipeline_mode<synchronous>, transform_indices = @transform_4, window_bounds = array<i64: 1, 256>}, {pipeline_mode = #tpu.pipeline_mode<synchronous>, transform_indices = @transform_5, window_bounds = array<i64: 256, 256>}, {pipeline_mode = #tpu.pipeline_mode<synchronous>, transform_indices = @transform_6, window_bounds = array<i64: 1, 256>}, {pipeline_mode = #tpu.pipeline_mode<synchronous>, transform_indices = @transform_7, window_bounds = array<i64: 256, 128>}, {pipeline_mode = #tpu.pipeline_mode<synchronous>, transform_indices = @transform_8, window_bounds = array<i64: 1, 128>}, {transform_indices = @transform_9, window_bounds = array<i64: 16, 128>}]} {
    %c0 = arith.constant 0 : index
    %c0_0 = arith.constant 0 : index
    %0 = vector.load %arg1[%c0, %c0_0] : memref<16x16xf32, #tpu.memory_space<vmem>>, vector<16x16xf32>
    %c0_1 = arith.constant 0 : index
    %c0_2 = arith.constant 0 : index
    %1 = vector.load %arg3[%c0_1, %c0_2] : memref<16x256xf32, #tpu.memory_space<vmem>>, vector<16x256xf32>
    %cst = arith.constant dense<0.000000e+00> : vector<16x256xf32>
    %2 = tpu.matmul %0, %1, %cst {dimension_numbers = #tpu.dot_dimension_numbers<[1], [0], [0], [1], [0, 0, 1, 1], [], []>} : vector<16x16xf32>, vector<16x256xf32>, vector<16x256xf32> -> vector<16x256xf32>
    %c0_3 = arith.constant 0 : index
    %c0_4 = arith.constant 0 : index
    %3 = vector.load %arg2[%c0_3, %c0_4] : memref<16x16xf32, #tpu.memory_space<vmem>>, vector<16x16xf32>
    %c0_5 = arith.constant 0 : index
    %c0_6 = arith.constant 0 : index
    %4 = vector.load %arg4[%c0_5, %c0_6] : memref<16x256xf32, #tpu.memory_space<vmem>>, vector<16x256xf32>
    %cst_7 = arith.constant dense<0.000000e+00> : vector<16x256xf32>
    %5 = tpu.matmul %3, %4, %cst_7 {dimension_numbers = #tpu.dot_dimension_numbers<[1], [0], [0], [1], [0, 0, 1, 1], [], []>} : vector<16x16xf32>, vector<16x256xf32>, vector<16x256xf32> -> vector<16x256xf32>
    %6 = arith.addf %2, %5 : vector<16x256xf32>
    %c0_8 = arith.constant 0 : index
    %c0_9 = arith.constant 0 : index
    %7 = vector.load %arg5[%c0_8, %c0_9] : memref<1x256xf32, #tpu.memory_space<vmem>>, vector<1x256xf32>
    %8 = vector.broadcast %7 : vector<1x256xf32> to vector<16x256xf32>
    %9 = arith.addf %6, %8 : vector<16x256xf32>
    %cst_10 = arith.constant 0.000000e+00 : f32
    %10 = vector.broadcast %cst_10 : f32 to vector<16x256xf32>
    %11 = arith.maximumf %9, %10 : vector<16x256xf32>
    %c0_11 = arith.constant 0 : index
    %c0_12 = arith.constant 0 : index
    %12 = vector.load %arg6[%c0_11, %c0_12] : memref<256x256xf32, #tpu.memory_space<vmem>>, vector<256x256xf32>
    %cst_13 = arith.constant dense<0.000000e+00> : vector<16x256xf32>
    %13 = tpu.matmul %11, %12, %cst_13 {dimension_numbers = #tpu.dot_dimension_numbers<[1], [0], [0], [1], [0, 0, 1, 1], [], []>} : vector<16x256xf32>, vector<256x256xf32>, vector<16x256xf32> -> vector<16x256xf32>
    %c0_14 = arith.constant 0 : index
    %c0_15 = arith.constant 0 : index
    %14 = vector.load %arg7[%c0_14, %c0_15] : memref<1x256xf32, #tpu.memory_space<vmem>>, vector<1x256xf32>
    %15 = vector.broadcast %14 : vector<1x256xf32> to vector<16x256xf32>
    %16 = arith.addf %13, %15 : vector<16x256xf32>
    %cst_16 = arith.constant 0.000000e+00 : f32
    %17 = vector.broadcast %cst_16 : f32 to vector<16x256xf32>
    %18 = arith.maximumf %16, %17 : vector<16x256xf32>
    %c0_17 = arith.constant 0 : index
    %c0_18 = arith.constant 0 : index
    %19 = vector.load %arg8[%c0_17, %c0_18] : memref<256x128xf32, #tpu.memory_space<vmem>>, vector<256x128xf32>
    %cst_19 = arith.constant dense<0.000000e+00> : vector<16x128xf32>
    %20 = tpu.matmul %18, %19, %cst_19 {dimension_numbers = #tpu.dot_dimension_numbers<[1], [0], [0], [1], [0, 0, 1, 1], [], []>} : vector<16x256xf32>, vector<256x128xf32>, vector<16x128xf32> -> vector<16x128xf32>
    %c0_20 = arith.constant 0 : index
    %c0_21 = arith.constant 0 : index
    %21 = vector.load %arg9[%c0_20, %c0_21] : memref<1x128xf32, #tpu.memory_space<vmem>>, vector<1x128xf32>
    %22 = vector.broadcast %21 : vector<1x128xf32> to vector<16x128xf32>
    %23 = arith.addf %20, %22 : vector<16x128xf32>
    %c0_22 = arith.constant 0 : index
    %c0_23 = arith.constant 0 : index
    %24 = vector.load %arg10[%c0_22, %c0_23] : memref<16x128xf32, #tpu.memory_space<vmem>>, vector<16x128xf32>
    tpu.vector_store %arg10[%c0_22, %c0_23], %23 {strides = array<i32>} : memref<16x128xf32, #tpu.memory_space<vmem>>, vector<16x128xf32>,
    return
  }
  func.func @transform_0(%arg0: i32) -> (i32, i32) {
    %c0_i32 = arith.constant 0 : i32
    %c0_i32_0 = arith.constant 0 : i32
    return %arg0, %c0_i32 : i32, i32
  }
  func.func @transform_1(%arg0: i32) -> (i32, i32) {
    %c0_i32 = arith.constant 0 : i32
    %c0_i32_0 = arith.constant 0 : i32
    return %arg0, %c0_i32 : i32, i32
  }
  func.func @transform_2(%arg0: i32) -> (i32, i32) {
    %c0_i32 = arith.constant 0 : i32
    %c0_i32_0 = arith.constant 0 : i32
    %c0_i32_1 = arith.constant 0 : i32
    return %c0_i32, %c0_i32_0 : i32, i32
  }
  func.func @transform_3(%arg0: i32) -> (i32, i32) {
    %c0_i32 = arith.constant 0 : i32
    %c0_i32_0 = arith.constant 0 : i32
    %c0_i32_1 = arith.constant 0 : i32
    return %c0_i32, %c0_i32_0 : i32, i32
  }
  func.func @transform_4(%arg0: i32) -> (i32, i32) {
    %c0_i32 = arith.constant 0 : i32
    %c0_i32_0 = arith.constant 0 : i32
    %c0_i32_1 = arith.constant 0 : i32
    return %c0_i32, %c0_i32_0 : i32, i32
  }
  func.func @transform_5(%arg0: i32) -> (i32, i32) {
    %c0_i32 = arith.constant 0 : i32
    %c0_i32_0 = arith.constant 0 : i32
    %c0_i32_1 = arith.constant 0 : i32
    return %c0_i32, %c0_i32_0 : i32, i32
  }
  func.func @transform_6(%arg0: i32) -> (i32, i32) {
    %c0_i32 = arith.constant 0 : i32
    %c0_i32_0 = arith.constant 0 : i32
    %c0_i32_1 = arith.constant 0 : i32
    return %c0_i32, %c0_i32_0 : i32, i32
  }
  func.func @transform_7(%arg0: i32) -> (i32, i32) {
    %c0_i32 = arith.constant 0 : i32
    %c0_i32_0 = arith.constant 0 : i32
    %c0_i32_1 = arith.constant 0 : i32
    return %c0_i32, %c0_i32_0 : i32, i32
  }
  func.func @transform_8(%arg0: i32) -> (i32, i32) {
    %c0_i32 = arith.constant 0 : i32
    %c0_i32_0 = arith.constant 0 : i32
    %c0_i32_1 = arith.constant 0 : i32
    return %c0_i32, %c0_i32_0 : i32, i32
  }
  func.func @transform_9(%arg0: i32) -> (i32, i32) {
    %c0_i32 = arith.constant 0 : i32
    %c0_i32_0 = arith.constant 0 : i32
    return %arg0, %c0_i32 : i32, i32
  }
}

</mosaic_0001>

<bundles_post_ra>
// kernel: tpu_custom_call.1
= control target key start
LH: loop header
LB: loop body
LE: loop exit
PB: predicated region body
PF: predicated region fallthrough
CT: control target
= control target key end

     0   :  { %s1459_s0 = inlined_call_operand.vmem [shape: f32[24,16], index: 0, kind: input, shape index: {}]   ;;  %s1460_s1 = inlined_call_operand.vmem [shape: f32[24,16], index: 1, kind: input, shape index: {}]   ;;  %s1461_s2 = inlined_call_operand.vmem [shape: f32[16,256], index: 2, kind: input, shape index: {}]   ;;  %s1462_s3 = inlined_call_operand.vmem [shape: f32[16,256], index: 3, kind: input, shape index: {}]   ;;  %s1463_s4 = inlined_call_operand.vmem [shape: f32[1,256], index: 4, kind: input, shape index: {}]   ;;  %s1464_s5 = inlined_call_operand.hbm [shape: f32[256,256], index: 5, kind: input, shape index: {}]   ;;  %s1465_s6 = inlined_call_operand.vmem [shape: f32[1,256], index: 6, kind: input, shape index: {}]   ;;  %s1466_s7 = inlined_call_operand.hbm [shape: f32[256,128], index: 7, kind: input, shape index: {}]   ;;  %s1467_s8 = inlined_call_operand.vmem [shape: f32[1,128], index: 8, kind: input, shape index: {}]   ;;  %s1468_s9 = inlined_call_operand.hbm [shape: f32[24,128], index: 9, kind: output, shape index: {}]  }
   0x1   :  { %1470 = sst [smem:[#allocation11_spill]] %s1464_s5 }
   0x2   :  { %1471 = sst [smem:[#allocation12_spill]] %s1466_s7 }
   0x3   :  { %14 = vsyncpa [#allocation3], 0 }
   0x4   :  { %15 = vsyncpa [#allocation6], 0 }
   0x5   :  { %16 = vsyncpa [#allocation4], 0 }
   0x6   :  { %18 = vsyncpa [#allocation4 + $0x1], 0  ;;  %s1265_s30 = smov 0   ;;  %s1267_s10 = smov 0  }
   0x7   :  { %s1269_s11 = smov 0   ;;  %s1271_s12 = smov 0  }
   0x8 LB: > { %s1286_s13 = sadd.s32 4294967295, %s1204_s12   ;;  %s934_s14 = sadd.s32 4294967294, %s1204_s12   ;;  %s1204_s12 = sphi %s1271_s12, %s1482_s12   ;;  %s1200_s11 = sphi %s1269_s11, %s1481_s11   ;;  %s1196_s10 = sphi %s1267_s10, %s1480_s10   ;;  %s1192_s30 = sphi %s1265_s30, %s1479_s30  }
   0x9   : > { %s1290_s15 = sadd.s32 1, %s1204_s12   ;;  %s230_s16 = sadd.s32 1, %s1200_s11 }
   0xa   : > { %s227_s17 = ssub.s32 %s1204_s12, %s1290_s15  ;;  %p240_p0 = scmp.ne.s32.totalorder %s1200_s11, %s1196_s10 }
   0xb   : > { %p228_p1 = scmp.eq.s32.totalorder %s227_s17, 0  ;;  %p241_p2 = scmp.eq.s32.totalorder %s1286_s13, 1 }
   0xc   : > { %p246_p3 = scmp.ne.s32.totalorder %s1196_s10, %s1192_s30  ;;  %p247_p4 = scmp.eq.s32.totalorder %s934_s14, 1 }
   0xd   : > { %s1301_s18 = scalar_select %p228_p1, %s1200_s11, %s230_s16  }
   0xe   : > { %p1303_p5 = por %p241_p2, %p240_p0  ;;  %p1307_p6 = por %p247_p4, %p246_p3 }
   0xf   : > { %p935_p7 = scmp.ge.s32.totalorder %s1204_s12, 1  ;;  %p254_p8 = scmp.lt.s32.totalorder %s1204_s12, 3 }
  0x10   : > { %p1017_p9 = scmp.eq.s32.totalorder %s1286_s13, 0  ;;  %s1475_s5 = sld [smem:[#allocation11_spill]] }
  0x11   : > { %p1314_p10 = pnand %p935_p7, %p254_p8  ;;  %s1206_s25 = smov [#allocation2]  }
  0x12   : > { %s276_s26 = sshll.u32 %s1206_s25, 4  ;;  %s1476_s7 = sld [smem:[#allocation12_spill]]  ;;  %s277_s26 = int_to_ptr.vmem [resolvable:$true] %s276_s26 }
  0x13   : > { %p1006_p11 = pneg %p1314_p10  ;;  %s1207_s14 = smov 256  }
  0x14   : > { %s1208_s16 = smov 16   ;;  %s1209_s17 = smov [#allocation5]  }
  0x15   : > { %p1007_p12 = pnand %p1017_p9, %p1006_p11  ;;  %s293_s22 = sshll.u32 %s1209_s17, 4  ;;  %s294_s22 = int_to_ptr.vmem [resolvable:$true] %s293_s22 }
  0x16   : > { %s274_s24 = sshll.u32 %s1475_s5, 4  ;;  %s1210_s23 = smov 128   ;;  %s275_s24 = int_to_ptr.hbm [resolvable:$true] %s274_s24 }
  0x17   : > { %1009 = dma.hbm_to_vmem [thread:$0]  (!%p1007_p12), %s275_s24, 8192, %s277_s26, [#allocation3], %s1207_s14, %s1207_s14, %s1208_s16  }
  0x18   : > { %s291_s29 = sshll.u32 %s1476_s7, 4  ;;  %s1211_s5 = smov 8   ;;  %s292_s29 = int_to_ptr.hbm [resolvable:$true] %s291_s29 }
  0x19   : > { %1012 = dma.hbm_to_vmem [thread:$0]  (!%p1007_p12), %s292_s29, 4096, %s294_s22, [#allocation6], %s1210_s23, %s1210_s23, %s1211_s5  }
  0x1a   : > { %346 = sbr.rel (%p1314_p10) target bundleno = 493 (0x1ed), region = 56 }
  0x1f   : > { %1179 = dma.done.wait (%p1017_p9), [#allocation3], 8192  }
  0x20   : > { %1181 = vsyncadd (%p1017_p9), [#allocation3], 4294959104 }
  0x21   : > { %1183 = dma.done.wait (%p1017_p9), [#allocation6], 4096  }
  0x22   : > { %1185 = vsyncadd (%p1017_p9), [#allocation6], 4294963200  ;;  %s1339_s24 = sshll.u32 %s1286_s13, 1  ;;  %v438_v0 = vld [vmem:[%s1461_s2 + $0x10] sm:$0xff]  ;;  %v436_v1 = vld [vmem:[%s1461_s2] sm:$0xff]  ;;  %vm446_vm0 = vcmask 130048  }
  0x23   : > { %p406_p13 = scmp.lt.s32.totalorder %s1339_s24, 2  ;;  %v439_v2 = vld [vmem:[%s1461_s2 + $0x18] sm:$0xff]  ;;  %519 = vmatpush.msra.mxu2 %v438_v0  ;;  %v437_v4 = vld [vmem:[%s1461_s2 + $0x8] sm:$0xff]  ;;  %v444_v5 = vld [vmem:[%s1462_s3 + $0x10] sm:$0xff]  ;;  %s398_s26 = sand.u32 1, %s1196_s10  }
  0x24   : > { %542 = vmatpush.msra.mxu3 %v439_v2  ;;  %467 = vmatpush.msra.mxu0 %v444_v5  ;;  %v442_v6 = vld [vmem:[%s1462_s3] sm:$0xff]  ;;  %v445_v7 = vld [vmem:[%s1462_s3 + $0x18] sm:$0xff]  ;;  %v443_v9 = vld [vmem:[%s1462_s3 + $0x8] sm:$0xff]  ;;  %s942_s14 = sshll.u32 %s398_s26, 4  ;;  %s824_s17 = ssub.s32 (%p1303_p5), 3, %s1339_s24 }
  0x25   : > { %s407_s5 = scalar_select %p406_p13, %s1339_s24, 2  ;;  %520 = vmatpush.msra.mxu2 %v436_v1  ;;  %v595_v10 = vld [vmem:[#allocation2 + $0xf0] sm:$0xff]  ;;  %v596_v11 = vld [vmem:[#allocation2 + $0xf8] sm:$0xff]  ;;  %490 = vmatpush.msra.mxu1 %v445_v7  ;;  %v594_v12 = vld [vmem:[#allocation2 + $0xe8] sm:$0xff] }
  0x26   : > { %543 = vmatpush.msra.mxu3 %v437_v4  ;;  %468 = vmatpush.msra.mxu0 %v442_v6  ;;  %v593_v13 = vld [vmem:[#allocation2 + $0xe0] sm:$0xff]  ;;  %v627_v14 = vld [vmem:[#allocation2 + $0x1f0] sm:$0xff]  ;;  %v628_v15 = vld [vmem:[#allocation2 + $0x1f8] sm:$0xff]  ;;  %s400_s16 = scalar_lea.vmem [#allocation7], %s942_s14  ;;  %p825_p0 = scmp.lt.s32.totalorder (%p1303_p5), %s824_s17, 2 }
  0x27   : > { %s944_s21 = sshll.u32 %s407_s5, 3  ;;  %681 = vmatpush.msrb.mxu2 %v596_v11  ;;  %491 = vmatpush.msra.mxu1 %v443_v9  ;;  %v592_v16 = vld [vmem:[#allocation2 + $0xd8] sm:$0xff]  ;;  %v591_v17 = vld [vmem:[#allocation2 + $0xd0] sm:$0xff]  ;;  %v625_v18 = vld [vmem:[#allocation2 + $0x1e0] sm:$0xff] }
  0x28   : > { %s1346_s27 = scalar_lea.vmem %s1459_s0, %s944_s21  ;;  %s1360_s7 = scalar_lea.vmem %s1460_s1, %s944_s21  ;;  %635 = vmatpush.msrb.mxu0 %v595_v10  ;;  %704 = vmatpush.msrb.mxu3 %v628_v15  ;;  %v626_v20 = vld [vmem:[#allocation2 + $0x1e8] sm:$0xff]  ;;  %v589_v21 = vld [vmem:[#allocation2 + $0xc0] sm:$0xff]  ;;  %v623_v23 = vld [vmem:[#allocation2 + $0x1d0] sm:$0xff] }
  0x29   : > { %v434_v3 = vld [vmem:[%s1346_s27] sm:$0xff]  ;;  %682 = vmatpush.msrb.mxu2 %v594_v12  ;;  %v435_v19 = vld [vmem:[%s1346_s27 + $0x8] sm:$0xff]  ;;  %658 = vmatpush.msrb.mxu1 %v627_v14  ;;  %v624_v25 = vld [vmem:[#allocation2 + $0x1d8] sm:$0xff]  ;;  %s1399_s21 = scalar_lea.sflag [#allocation4], %s398_s26 }
  0x2a   : > { %v440_v8 = vld [vmem:[%s1360_s7] sm:$0xff]  ;;  %951 = vmatmul.msk.f32.vlgmr.msra.gmra.mxu2 %vm446_vm0, %v434_v3  ;;  %953 = vmatmul.msk.f32.vlgmr.msra.gmra.mxu3 %vm446_vm0, %v434_v3  ;;  %v441_v22 = vld [vmem:[%s1360_s7 + $0x8] sm:$0xff]  ;;  %v587_v26 = vld [vmem:[#allocation2 + $0xb0] sm:$0xff] }
  0x2b   : > { %947 = vmatmul.msk.f32.vlgmr.msra.gmra.mxu0 %vm446_vm0, %v440_v8  ;;  %949 = vmatmul.msk.f32.vlgmr.msra.gmra.mxu1 %vm446_vm0, %v440_v8  ;;  %v590_v24 = vld [vmem:[#allocation2 + $0xc8] sm:$0xff]  ;;  %v621_v27 = vld [vmem:[#allocation2 + $0x1c0] sm:$0xff]  ;;  %v588_v28 = vld [vmem:[#allocation2 + $0xb8] sm:$0xff] }
  0x2c   : > { %636 = vmatpush.msrb.mxu0 %v593_v13  ;;  %683 = vmatpush.msrb.mxu2 %v592_v16  ;;  %v622_v29 = vld [vmem:[#allocation2 + $0x1c8] sm:$0xff]  ;;  %v585_v30 = vld [vmem:[#allocation2 + $0xa0] sm:$0xff]  ;;  %v619_v31 = vld [vmem:[#allocation2 + $0x1b0] sm:$0xff] }
  0x2d   : > { %659 = vmatpush.msrb.mxu1 %v625_v18  ;;  %705 = vmatpush.msrb.mxu3 %v626_v20  ;;  %v586_v32 = vld [vmem:[#allocation2 + $0xa8] sm:$0xff]  ;;  %v620_v33 = vld [vmem:[#allocation2 + $0x1b8] sm:$0xff]  ;;  %v583_v34 = vld [vmem:[#allocation2 + $0x90] sm:$0xff] }
  0x2e   : > { %637 = vmatpush.msrb.mxu0 %v591_v17  ;;  %684 = vmatpush.msrb.mxu2 %v590_v24  ;;  %v617_v35 = vld [vmem:[#allocation2 + $0x1a0] sm:$0xff]  ;;  %v584_v36 = vld [vmem:[#allocation2 + $0x98] sm:$0xff]  ;;  %v618_v37 = vld [vmem:[#allocation2 + $0x1a8] sm:$0xff] }
  0x2f   : > { %660 = vmatpush.msrb.mxu1 %v623_v23  ;;  %706 = vmatpush.msrb.mxu3 %v624_v25  ;;  %v581_v38 = vld [vmem:[#allocation2 + $0x80] sm:$0xff]  ;;  %v615_v39 = vld [vmem:[#allocation2 + $0x190] sm:$0xff]  ;;  %v582_v40 = vld [vmem:[#allocation2 + $0x88] sm:$0xff] }
  0x30   : > { %638 = vmatpush.msrb.mxu0 %v589_v21  ;;  %685 = vmatpush.msrb.mxu2 %v588_v28  ;;  %v616_v41 = vld [vmem:[#allocation2 + $0x198] sm:$0xff]  ;;  %v579_v42 = vld [vmem:[#allocation2 + $0x70] sm:$0xff]  ;;  %v613_v43 = vld [vmem:[#allocation2 + $0x180] sm:$0xff] }
  0x31   : > { %661 = vmatpush.msrb.mxu1 %v621_v27  ;;  %707 = vmatpush.msrb.mxu3 %v622_v29  ;;  %v580_v44 = vld [vmem:[#allocation2 + $0x78] sm:$0xff]  ;;  %v614_v45 = vld [vmem:[#allocation2 + $0x188] sm:$0xff]  ;;  %v577_v46 = vld [vmem:[#allocation2 + $0x60] sm:$0xff] }
  0x32   : > { %952 = vmatmul.msk.f32.gmra.mxu2 %vm446_vm0, %v435_v19  ;;  %954 = vmatmul.msk.f32.gmra.mxu3 %vm446_vm0, %v435_v19  ;;  %v611_v47 = vld [vmem:[#allocation2 + $0x170] sm:$0xff]  ;;  %v578_v48 = vld [vmem:[#allocation2 + $0x68] sm:$0xff]  ;;  %v612_v49 = vld [vmem:[#allocation2 + $0x178] sm:$0xff] }
  0x33   : > { %948 = vmatmul.msk.f32.gmra.mxu0 %vm446_vm0, %v441_v22  ;;  %950 = vmatmul.msk.f32.gmra.mxu1 %vm446_vm0, %v441_v22  ;;  %v575_v50 = vld [vmem:[#allocation2 + $0x50] sm:$0xff]  ;;  %v609_v51 = vld [vmem:[#allocation2 + $0x160] sm:$0xff]  ;;  %v576_v52 = vld [vmem:[#allocation2 + $0x58] sm:$0xff] }
  0x34   : > { %639 = vmatpush.msrb.mxu0 %v587_v26  ;;  %662 = vmatpush.msrb.mxu1 %v619_v31  ;;  %v610_v53 = vld [vmem:[#allocation2 + $0x168] sm:$0xff]  ;;  %v573_v54 = vld [vmem:[#allocation2 + $0x40] sm:$0xff]  ;;  %v607_v55 = vld [vmem:[#allocation2 + $0x150] sm:$0xff] }
  0x35   : > { %686 = vmatpush.msrb.mxu2 %v586_v32  ;;  %708 = vmatpush.msrb.mxu3 %v620_v33  ;;  %v574_v56 = vld [vmem:[#allocation2 + $0x48] sm:$0xff]  ;;  %v608_v57 = vld [vmem:[#allocation2 + $0x158] sm:$0xff]  ;;  %v571_v58 = vld [vmem:[#allocation2 + $0x30] sm:$0xff] }
  0x36   : > { %640 = vmatpush.msrb.mxu0 %v585_v30  ;;  %663 = vmatpush.msrb.mxu1 %v617_v35  ;;  %v605_v59 = vld [vmem:[#allocation2 + $0x140] sm:$0xff]  ;;  %v572_v60 = vld [vmem:[#allocation2 + $0x38] sm:$0xff]  ;;  %v606_v61 = vld [vmem:[#allocation2 + $0x148] sm:$0xff] }
  0x37   : > { %687 = vmatpush.msrb.mxu2 %v584_v36  ;;  %709 = vmatpush.msrb.mxu3 %v618_v37  ;;  %v569_v62 = vld [vmem:[#allocation2 + $0x20] sm:$0xff]  ;;  %v603_v63 = vld [vmem:[#allocation2 + $0x130] sm:$0xff]  ;;  %v570_v0 = vld [vmem:[#allocation2 + $0x28] sm:$0xff] }
  0x38   : > { %641 = vmatpush.msrb.mxu0 %v583_v34  ;;  %664 = vmatpush.msrb.mxu1 %v615_v39  ;;  %v604_v1 = vld [vmem:[#allocation2 + $0x138] sm:$0xff]  ;;  %v567_v2 = vld [vmem:[#allocation2 + $0x10] sm:$0xff]  ;;  %v601_v3 = vld [vmem:[#allocation2 + $0x120] sm:$0xff] }
  0x39   : > { %688 = vmatpush.msrb.mxu2 %v582_v40  ;;  %710 = vmatpush.msrb.mxu3 %v616_v41  ;;  %v568_v4 = vld [vmem:[#allocation2 + $0x18] sm:$0xff]  ;;  %v602_v5 = vld [vmem:[#allocation2 + $0x128] sm:$0xff]  ;;  %v565_v6 = vld [vmem:[#allocation2] sm:$0xff] }
  0x3a   : > { %642 = vmatpush.msrb.mxu0 %v581_v38  ;;  %665 = vmatpush.msrb.mxu1 %v613_v43  ;;  %v599_v7 = vld [vmem:[#allocation2 + $0x110] sm:$0xff]  ;;  %v566_v8 = vld [vmem:[#allocation2 + $0x8] sm:$0xff]  ;;  %v600_v9 = vld [vmem:[#allocation2 + $0x118] sm:$0xff] }
  0x3b   : > { %689 = vmatpush.msrb.mxu2 %v580_v44  ;;  %711 = vmatpush.msrb.mxu3 %v614_v45  ;;  %v597_v10 = vld [vmem:[#allocation2 + $0x100] sm:$0xff]  ;;  %v598_v11 = vld [vmem:[#allocation2 + $0x108] sm:$0xff]  ;;  %v746_v12 = vld [vmem:[#allocation5 + $0x78] sm:$0xff] }
  0x3c   : > { %643 = vmatpush.msrb.mxu0 %v579_v42  ;;  %666 = vmatpush.msrb.mxu1 %v611_v47  ;;  %v745_v13 = vld [vmem:[#allocation5 + $0x70] sm:$0xff]  ;;  %v762_v14 = vld [vmem:[#allocation5 + $0xf8] sm:$0xff]  ;;  %v744_v15 = vld [vmem:[#allocation5 + $0x68] sm:$0xff] }
  0x3d   : > { %690 = vmatpush.msrb.mxu2 %v578_v48  ;;  %712 = vmatpush.msrb.mxu3 %v612_v49  ;;  %v761_v16 = vld [vmem:[#allocation5 + $0xf0] sm:$0xff]  ;;  %v760_v17 = vld [vmem:[#allocation5 + $0xe8] sm:$0xff]  ;;  %v743_v18 = vld [vmem:[#allocation5 + $0x60] sm:$0xff] }
  0x3e   : > { %644 = vmatpush.msrb.mxu0 %v577_v46  ;;  %667 = vmatpush.msrb.mxu1 %v609_v51  ;;  %v759_v19 = vld [vmem:[#allocation5 + $0xe0] sm:$0xff]  ;;  %v742_v20 = vld [vmem:[#allocation5 + $0x58] sm:$0xff]  ;;  %v741_v22 = vld [vmem:[#allocation5 + $0x50] sm:$0xff] }
  0x3f   : > { %691 = vmatpush.msrb.mxu2 %v576_v52  ;;  %713 = vmatpush.msrb.mxu3 %v610_v53  ;;  %v758_v21 = vld [vmem:[#allocation5 + $0xd8] sm:$0xff]  ;;  %v757_v23 = vld [vmem:[#allocation5 + $0xd0] sm:$0xff]  ;;  %v740_v24 = vld [vmem:[#allocation5 + $0x48] sm:$0xff] }
  0x40   : > { %645 = vmatpush.msrb.mxu0 %v575_v50  ;;  %668 = vmatpush.msrb.mxu1 %v607_v55  ;;  %v756_v25 = vld [vmem:[#allocation5 + $0xc8] sm:$0xff]  ;;  %v551_v27 = vld [vmem:[%s1463_s4] sm:$0x3]  ;;  %v738_v31 = vld [vmem:[#allocation5 + $0x38] sm:$0xff] }
  0x41   : > { %692 = vmatpush.msrb.mxu2 %v574_v56  ;;  %714 = vmatpush.msrb.mxu3 %v608_v57  ;;  %v739_v28 = vld [vmem:[#allocation5 + $0x40] sm:$0xff]  ;;  %v553_v32 = vperm.slane %v551_v27, 0  ;;  %v554_v33 = vperm.slane %v551_v27, 1  ;;  %v754_v34 = vld [vmem:[#allocation5 + $0xb8] sm:$0xff]  ;;  %v737_v37 = vld [vmem:[#allocation5 + $0x30] sm:$0xff] }
  0x42   : > { %646 = vmatpush.msrb.mxu0 %v573_v54  ;;  %669 = vmatpush.msrb.mxu1 %v605_v59  ;;  %v755_v29 = vld [vmem:[#allocation5 + $0xc0] sm:$0xff]  ;;  %v736_v40 = vld [vmem:[#allocation5 + $0x28] sm:$0xff]  ;;  %v734_v56 = vld [vmem:[#allocation5 + $0x18] sm:$0xff] }
  0x43   : > { %693 = vmatpush.msrb.mxu2 %v572_v60  ;;  %715 = vmatpush.msrb.mxu3 %v606_v61  ;;  %v735_v47 = vld [vmem:[#allocation5 + $0x20] sm:$0xff]  ;;  %v753_v57 = vld [vmem:[#allocation5 + $0xb0] sm:$0xff]  ;;  %v752_v59 = vld [vmem:[#allocation5 + $0xa8] sm:$0xff] }
  0x44   : > { %647 = vmatpush.msrb.mxu0 %v571_v58  ;;  %670 = vmatpush.msrb.mxu1 %v603_v63  ;;  %v733_v58 = vld [vmem:[#allocation5 + $0x10] sm:$0xff]  ;;  %v732_v60 = vld [vmem:[#allocation5 + $0x8] sm:$0xff]  ;;  %v751_v61 = vld [vmem:[#allocation5 + $0xa0] sm:$0xff] }
  0x45   : > { %694 = vmatpush.msrb.mxu2 %v570_v0  ;;  %716 = vmatpush.msrb.mxu3 %v604_v1  ;;  %v750_v63 = vld [vmem:[#allocation5 + $0x98] sm:$0xff]  ;;  %v749_v0 = vld [vmem:[#allocation5 + $0x90] sm:$0xff]  ;;  %v748_v1 = vld [vmem:[#allocation5 + $0x88] sm:$0xff] }
  0x46   : > { %648 = vmatpush.msrb.mxu0 %v569_v62  ;;  %671 = vmatpush.msrb.mxu1 %v601_v3  ;;  %v731_v62 = vld [vmem:[#allocation5] sm:$0xff] }
  0x47   : > { %695 = vmatpush.msrb.mxu2 %v568_v4  ;;  %717 = vmatpush.msrb.mxu3 %v602_v5  ;;  %v629_v3 = vld [vmem:[%s1465_s6] sm:$0x3] }
  0x48   : > { %649 = vmatpush.msrb.mxu0 %v567_v2  ;;  %672 = vmatpush.msrb.mxu1 %v599_v7  ;;  %v747_v2 = vld [vmem:[#allocation5 + $0x80] sm:$0xff]  ;;  %v631_v4 = vperm.slane %v629_v3, 0 }
  0x49   : > { %696 = vmatpush.msrb.mxu2 %v566_v8  ;;  %718 = vmatpush.msrb.mxu3 %v600_v9  ;;  %v632_v9 = vperm.slane %v629_v3, 1 }
  0x4a   : > { %650 = vmatpush.msrb.mxu0 %v565_v6  ;;  %673 = vmatpush.msrb.mxu1 %v597_v10 }
  0x4b   : > { %719 = vmatpush.msrb.mxu3 %v598_v11  ;;  %965 = vmatpush.msra.mxu2 %v746_v12 }
  0x4c   : > { %767 = vmatpush.msra.mxu0 %v746_v12  ;;  %790 = vmatpush.msra.mxu1 %v762_v14 }
  0x4d   : > { %981 = vmatpush.msra.mxu3 %v762_v14  ;;  %966 = vmatpush.msra.mxu2 %v745_v13 }
  0x4e   : > { %768 = vmatpush.msra.mxu0 %v745_v13  ;;  %791 = vmatpush.msra.mxu1 %v761_v16 }
  0x4f   : > { %982 = vmatpush.msra.mxu3 %v761_v16  ;;  %967 = vmatpush.msra.mxu2 %v744_v15 }
  0x50   : > { %769 = vmatpush.msra.mxu0 %v744_v15  ;;  %792 = vmatpush.msra.mxu1 %v760_v17 }
  0x51   : > { %983 = vmatpush.msra.mxu3 %v760_v17  ;;  %968 = vmatpush.msra.mxu2 %v743_v18 }
  0x52   : > { %770 = vmatpush.msra.mxu0 %v743_v18  ;;  %793 = vmatpush.msra.mxu1 %v759_v19 }
  0x53   : > { %984 = vmatpush.msra.mxu3 %v759_v19  ;;  %969 = vmatpush.msra.mxu2 %v742_v20 }
  0x54   : > { %771 = vmatpush.msra.mxu0 %v742_v20  ;;  %794 = vmatpush.msra.mxu1 %v758_v21 }
  0x55   : > { %985 = vmatpush.msra.mxu3 %v758_v21  ;;  %970 = vmatpush.msra.mxu2 %v741_v22 }
  0x56   : > { %772 = vmatpush.msra.mxu0 %v741_v22  ;;  %795 = vmatpush.msra.mxu1 %v757_v23 }
  0x57   : > { %986 = vmatpush.msra.mxu3 %v757_v23  ;;  %971 = vmatpush.msra.mxu2 %v740_v24 }
  0x58   : > { %773 = vmatpush.msra.mxu0 %v740_v24  ;;  %796 = vmatpush.msra.mxu1 %v756_v25 }
  0x59   : > { %987 = vmatpush.msra.mxu3 %v756_v25  ;;  %972 = vmatpush.msra.mxu2 %v739_v28 }
  0x5a   : > { %774 = vmatpush.msra.mxu0 %v739_v28  ;;  %797 = vmatpush.msra.mxu1 %v755_v29 }
  0x5b   : > { %988 = vmatpush.msra.mxu3 %v755_v29  ;;  %973 = vmatpush.msra.mxu2 %v738_v31 }
  0x5c   : > { %775 = vmatpush.msra.mxu0 %v738_v31  ;;  %798 = vmatpush.msra.mxu1 %v754_v34 }
  0x5d   : > { %989 = vmatpush.msra.mxu3 %v754_v34  ;;  %974 = vmatpush.msra.mxu2 %v737_v37 }
  0x5e   : > { %776 = vmatpush.msra.mxu0 %v737_v37  ;;  %799 = vmatpush.msra.mxu1 %v753_v57 }
  0x5f   : > { %975 = vmatpush.msra.mxu2 %v736_v40  ;;  %990 = vmatpush.msra.mxu3 %v753_v57 }
  0x60   : > { %777 = vmatpush.msra.mxu0 %v736_v40  ;;  %800 = vmatpush.msra.mxu1 %v752_v59 }
  0x61   : > { %976 = vmatpush.msra.mxu2 %v735_v47  ;;  %991 = vmatpush.msra.mxu3 %v752_v59 }
  0x62   : > { %778 = vmatpush.msra.mxu0 %v735_v47  ;;  %801 = vmatpush.msra.mxu1 %v751_v61 }
  0x63   : > { %977 = vmatpush.msra.mxu2 %v734_v56  ;;  %992 = vmatpush.msra.mxu3 %v751_v61 }
  0x64   : > { %779 = vmatpush.msra.mxu0 %v734_v56  ;;  %802 = vmatpush.msra.mxu1 %v750_v63 }
  0x65   : > { %978 = vmatpush.msra.mxu2 %v733_v58  ;;  %993 = vmatpush.msra.mxu3 %v750_v63 }
  0x66   : > { %780 = vmatpush.msra.mxu0 %v733_v58  ;;  %803 = vmatpush.msra.mxu1 %v749_v0 }
  0x67   : > { %979 = vmatpush.msra.mxu2 %v732_v60  ;;  %994 = vmatpush.msra.mxu3 %v749_v0 }
  0x68   : > { %781 = vmatpush.msra.mxu0 %v732_v60  ;;  %804 = vmatpush.msra.mxu1 %v748_v1 }
  0x69   : > { %980 = vmatpush.msra.mxu2 %v731_v62  ;;  %995 = vmatpush.msra.mxu3 %v748_v1 }
  0x6a   : > { %782 = vmatpush.msra.mxu0 %v731_v62  ;;  %805 = vmatpush.msra.mxu1 %v747_v2 }
  0x6b   : > { %996 = vmatpush.msra.mxu3 %v747_v2 }
  0xa8   : > { %v470_v26 = vpop.f32.mrf.mxu0  ;;  %v493_v30 = vpop.f32.mrf.mxu1 }
  0xad   : > { %v522_v35 = vpop.f32.mrf.mxu2  ;;  %v545_v36 = vpop.f32.mrf.mxu3 }
  0xae   : > { %v523_v38 = vadd.f32 %v522_v35, %v470_v26  ;;  %v546_v39 = vadd.f32 %v545_v36, %v493_v30  ;;  %v1062_v26 = vld [vmem:[%s1467_s8] ss:$0 sm:$0xff] }
  0xb0   : > { %v557_v41 = vadd.f32 %v553_v32, %v523_v38  ;;  %v558_v42 = vadd.f32 %v554_v33, %v546_v39  ;;  %v473_v45 = vpop.f32.mrf.mxu0  ;;  %v496_v46 = vpop.f32.mrf.mxu1 }
  0xb2   : > { %v561_v43 = vmax.f32 %v557_v41, 0.0  ;;  %v562_v44 = vmax.f32 %v558_v42, 0.0 }
  0xb4   : > { %651 = vmatmul.f32.vlgmr.msrb.gmra.mxu0 %v561_v43  ;;  %697 = vmatmul.f32.vlgmr.msrb.gmra.mxu2 %v561_v43 }
  0xb5   : > { %v525_v48 = vpop.f32.mrf.mxu2  ;;  %674 = vmatmul.f32.vlgmr.msrb.gmra.mxu1 %v562_v44  ;;  %720 = vmatmul.f32.vlgmr.msrb.gmra.mxu3 %v562_v44  ;;  %v548_v49 = vpop.f32.mrf.mxu3 }
  0xb6   : > { %v526_v50 = vadd.f32 %v525_v48, %v473_v45  ;;  %v549_v51 = vadd.f32 %v548_v49, %v496_v46 }
  0xb8   : > { %v559_v52 = vadd.f32 %v553_v32, %v526_v50  ;;  %v560_v53 = vadd.f32 %v554_v33, %v549_v51 }
  0xba   : > { %v563_v54 = vmax.f32 %v559_v52, 0.0  ;;  %v564_v55 = vmax.f32 %v560_v53, 0.0 }
  0xbc   : > { %654 = vmatmul.f32.gmra.mxu0 %v563_v54  ;;  %700 = vmatmul.f32.gmra.mxu2 %v563_v54 }
  0xbd   : > { %677 = vmatmul.f32.gmra.mxu1 %v564_v55  ;;  %723 = vmatmul.f32.gmra.mxu3 %v564_v55 }
 0x131   : > { %v652_v5 = vpop.f32.mrf.mxu0 }
 0x132   : > { %v653_v6 = vadd.f32 %v652_v5, %v631_v4  ;;  %v675_v7 = vpop.f32.mrf.mxu1 }
 0x134   : > { %v676_v8 = vadd.f32 %v675_v7, %v653_v6 }
 0x136   : > { %v727_v10 = vmax.f32 %v676_v8, 0.0 }
 0x137   : > { %v698_v11 = vpop.f32.mrf.mxu2 }
 0x138   : > { %v699_v12 = vadd.f32 %v698_v11, %v632_v9  ;;  %783 = vmatmul.f32.vlgmr.msra.gmra.mxu0 %v727_v10  ;;  %v721_v13 = vpop.f32.mrf.mxu3 }
 0x139   : > { %v655_v14 = vpop.f32.mrf.mxu0 }
 0x13a   : > { %v656_v15 = vadd.f32 %v655_v14, %v631_v4  ;;  %v722_v16 = vadd.f32 %v721_v13, %v699_v12  ;;  %v678_v17 = vpop.f32.mrf.mxu1 }
 0x13c   : > { %v728_v18 = vmax.f32 %v722_v16, 0.0  ;;  %v679_v19 = vadd.f32 %v678_v17, %v656_v15 }
 0x13e   : > { %v729_v20 = vmax.f32 %v679_v19, 0.0  ;;  %806 = vmatmul.f32.vlgmr.msra.gmra.mxu1 %v728_v18 }
 0x13f   : > { %v701_v21 = vpop.f32.mrf.mxu2 }
 0x140   : > { %v702_v22 = vadd.f32 %v701_v21, %v632_v9  ;;  %786 = vmatmul.f32.vlgmr.msra.gmra.mxu2 %v729_v20  ;;  %v724_v23 = vpop.f32.mrf.mxu3 }
 0x142   : > { %v725_v24 = vadd.f32 %v724_v23, %v702_v22 }
 0x144   : > { %v730_v25 = vmax.f32 %v725_v24, 0.0 }
 0x146   : > { %809 = vmatmul.f32.vlgmr.msra.gmra.mxu3 %v730_v25 }
 0x1b5   : > { %v784_v27 = vpop.f32.mrf.mxu0 }
 0x1b6   : > { %v785_v28 = vadd.f32 %v1062_v26, %v784_v27 }
 0x1bb   : > { %v807_v29 = vpop.f32.mrf.mxu1 }
 0x1bc   : > { %v808_v30 = vadd.f32 %v807_v29, %v785_v28 }
 0x1be   : > { %813 = vst [vmem:[%s400_s16] sm:$0xff] %v808_v30 }
 0x1c3   : > { %v787_v31 = vpop.f32.mrf.mxu2 }
 0x1c4   : > { %v788_v32 = vadd.f32 %v1062_v26, %v787_v31 }
 0x1c8   : > { %822 = sbr.rel (!%p1303_p5) target bundleno = 493 (0x1ed), region = 68 }
 0x1c9   : > { %v810_v33 = vpop.f32.mrf.mxu3 }
 0x1ca   : > { %v811_v34 = vadd.f32 %v810_v33, %v788_v32 }
 0x1cc   : > { %814 = vst [vmem:[%s400_s16 + $0x8] sm:$0xff] %v811_v34 }
 0x1cd   : > { %s1484_s17 = smov (!%p825_p0, %s824_s17), 2 }
 0x1ce   : > { %s957_s22 = sshll.u32 %s1484_s17, 3 }
 0x1cf   : > { %s828_s23 = ssub.s32 16, %s957_s22 }
 0x1d0   : > { %s829_s7 = sshll.u32 %s828_s23, 4 }
 0x1d1   : > { %830 = vsyncadd %s1399_s21, %s829_s7  ;;  %p1408_p1 = scmp.ne.s32.totalorder %s957_s22, 0  ;;  %s964_s19 = sshll.u32 %s1286_s13, 4 }
 0x1d2   : > { %s833_s24 = scalar_lea.hbm %s1468_s9, %s964_s19  ;;  %s835_s26 = sshll.u32 %s400_s16, 4  ;;  %s1416_s26 = int_to_ptr.vmem [resolvable:$true] %s835_s26 }
 0x1d3   : > { %s837_s28 = sshll.u32 %s833_s24, 4  ;;  %s1469_s29 = sshll.u32 %s1484_s17, 7  ;;  %s1418_s28 = int_to_ptr.hbm [resolvable:$true] %s837_s28 }
 0x1d4   : > { %s1123_s14 = sshra.s32 %s1416_s26, 4  ;;  %s1125_s22 = sshrl.u32 %s1469_s29, 4  ;;  %s1124_s14 = int_to_ptr.vmem [resolvable:$true] %s1123_s14 }
 0x1d5   : > { %s1130_s23 = scalar_lea.vmem %s1124_s14, %s1125_s22  ;;  %s1212_s13 = smov [#allocation7]  }
 0x1d6   : > { %p1131_p2 = scmp.ne.s32.totalorder %s1124_s14, %s1130_s23  ;;  %s1134_s7 = scalar_lea.vmem %s1212_s13, 32 }
 0x1d7   : > { %p1136_p5 = scmp.lt.s32.totalorder %s1134_s7, %s1130_s23 }
 0x1d8   : > { %p1132_p3 = pnand %p1131_p2, %p1408_p1 }
 0x1da   : > { %p1133_p4 = pneg %p1132_p3 }
 0x1dc   : > { %p1138_p7 = pnand %p1136_p5, %p1133_p4 }
 0x1de   : > { %1141 = shalt.err (!%p1138_p7)
}
 0x1df   : > { %s1142_s16 = sshra.s32 %s1418_s28, 4  ;;  %s1153_s24 = scalar_lea.hbm %s1468_s9, 24  ;;  %s1143_s16 = int_to_ptr.hbm [resolvable:$true] %s1142_s16 }
 0x1e0   : > { %s1149_s19 = scalar_lea.hbm %s1143_s16, %s1125_s22  ;;  %p1154_p11 = scmp.lt.s32.totalorder %s1143_s16, %s1468_s9 }
 0x1e1   : > { %p1150_p8 = scmp.ne.s32.totalorder %s1143_s16, %s1149_s19  ;;  %p1155_p12 = scmp.lt.s32.totalorder %s1153_s24, %s1149_s19 }
 0x1e3   : > { %p1151_p9 = pnand %p1150_p8, %p1408_p1  ;;  %p1156_p13 = por %p1155_p12, %p1154_p11 }
 0x1e5   : > { %p1152_p10 = pneg %p1151_p9 }
 0x1e7   : > { %p1157_p0 = pnand %p1156_p13, %p1152_p10 }
 0x1e9   : > { %1160 = shalt.err (!%p1157_p0)
}
 0x1ea   : > { %s1213_s23 = smov 128   ;;  %s1214_s22 = smov 8  }
 0x1eb   : > { %s1478_s13 = sshll.u32 %s1484_s17, 7 }
 0x1ec   : > { %843 = dma.vmem_to_hbm [thread:$0]  (%p1408_p1), %s1416_s26, %s1478_s13, %s1418_s28, %s1399_s21, %s1213_s23, %s1213_s23, %s1214_s22  }
 0x1ed PF: > { %p1021_p2 = scmp.ge.s32.totalorder %s1204_s12, 2  ;;  %s852_s29 = sand.u32 1, %s1192_s30  }
 0x1ee   : > { %s853_s7 = scalar_lea.sflag [#allocation4], %s852_s29 }
 0x1ef   : > { %p1014_p3 = pnand %p1021_p2, %p1307_p6 }
 0x1f1   : > { %p1015_p4 = pneg %p1014_p3 }
 0x1f3   : > { %1187 = dma.done.wait (%p1015_p4), %s853_s7, 256  }
 0x1f4   : > { %1189 = vsyncadd (%p1015_p4), %s853_s7, 4294967040  ;;  %p21_p5 = scmp.ge.s32.totalorder %s1290_s15, 4   ;;  %s1479_s30 = smov %s1196_s10 }
 0x1f5   : > { %s1480_s10 = smov %s1200_s11  ;;  %s1481_s11 = smov %s1301_s18 }
 0x1f6   : > { %s1482_s12 = smov %s1290_s15  ;;  %23 = sbr.rel (!%p21_p5) target bundleno = 8 (0x8), region = 103 }
 0x1fb   :  { %859 = vsyncpa [#allocation3], 1 }
 0x1fc   :  { %861 = vsyncpa [#allocation3 + $0x1], 1 }
 0x1fd   :  { %862 = vsyncpa [#allocation6], 1 }
 0x1fe   :  { %863 = vsyncpa [#allocation4], 1 }
 0x1ff   :  { %865 = vsyncpa [#allocation4 + $0x1], 1 }

// kernel: tpu_custom_call.1
= control target key start
LH: loop header
LB: loop body
LE: loop exit
PB: predicated region body
PF: predicated region fallthrough
CT: control target
= control target key end

     0   :  { %s1459_s0 = inlined_call_operand.vmem [shape: f32[24,16], index: 0, kind: input, shape index: {}]   ;;  %s1460_s1 = inlined_call_operand.vmem [shape: f32[24,16], index: 1, kind: input, shape index: {}]   ;;  %s1461_s2 = inlined_call_operand.vmem [shape: f32[16,256], index: 2, kind: input, shape index: {}]   ;;  %s1462_s3 = inlined_call_operand.vmem [shape: f32[16,256], index: 3, kind: input, shape index: {}]   ;;  %s1463_s4 = inlined_call_operand.vmem [shape: f32[1,256], index: 4, kind: input, shape index: {}]   ;;  %s1464_s5 = inlined_call_operand.hbm [shape: f32[256,256], index: 5, kind: input, shape index: {}]   ;;  %s1465_s6 = inlined_call_operand.vmem [shape: f32[1,256], index: 6, kind: input, shape index: {}]   ;;  %s1466_s7 = inlined_call_operand.hbm [shape: f32[256,128], index: 7, kind: input, shape index: {}]   ;;  %s1467_s8 = inlined_call_operand.vmem [shape: f32[1,128], index: 8, kind: input, shape index: {}]   ;;  %s1468_s9 = inlined_call_operand.hbm [shape: f32[24,128], index: 9, kind: output, shape index: {}]  }
   0x1   :  { %1470 = sst [smem:[#allocation11_spill]] %s1464_s5 }
   0x2   :  { %1471 = sst [smem:[#allocation12_spill]] %s1466_s7 }
   0x3   :  { %14 = vsyncpa [#allocation3], 0 }
   0x4   :  { %15 = vsyncpa [#allocation6], 0 }
   0x5   :  { %16 = vsyncpa [#allocation4], 0 }
   0x6   :  { %18 = vsyncpa [#allocation4 + $0x1], 0  ;;  %s1265_s30 = smov 0   ;;  %s1267_s10 = smov 0  }
   0x7   :  { %s1269_s11 = smov 0   ;;  %s1271_s12 = smov 0  }
   0x8 LB: > { %s1286_s13 = sadd.s32 4294967295, %s1204_s12   ;;  %s934_s14 = sadd.s32 4294967294, %s1204_s12   ;;  %s1204_s12 = sphi %s1271_s12, %s1482_s12   ;;  %s1200_s11 = sphi %s1269_s11, %s1481_s11   ;;  %s1196_s10 = sphi %s1267_s10, %s1480_s10   ;;  %s1192_s30 = sphi %s1265_s30, %s1479_s30  }
   0x9   : > { %s1290_s15 = sadd.s32 1, %s1204_s12   ;;  %s230_s16 = sadd.s32 1, %s1200_s11 }
   0xa   : > { %s227_s17 = ssub.s32 %s1204_s12, %s1290_s15  ;;  %p240_p0 = scmp.ne.s32.totalorder %s1200_s11, %s1196_s10 }
   0xb   : > { %p228_p1 = scmp.eq.s32.totalorder %s227_s17, 0  ;;  %p241_p2 = scmp.eq.s32.totalorder %s1286_s13, 1 }
   0xc   : > { %p246_p3 = scmp.ne.s32.totalorder %s1196_s10, %s1192_s30  ;;  %p247_p4 = scmp.eq.s32.totalorder %s934_s14, 1 }
   0xd   : > { %s1301_s18 = scalar_select %p228_p1, %s1200_s11, %s230_s16  }
   0xe   : > { %p1303_p5 = por %p241_p2, %p240_p0  ;;  %p1307_p6 = por %p247_p4, %p246_p3 }
   0xf   : > { %p935_p7 = scmp.ge.s32.totalorder %s1204_s12, 1  ;;  %p254_p8 = scmp.lt.s32.totalorder %s1204_s12, 3 }
  0x10   : > { %p1017_p9 = scmp.eq.s32.totalorder %s1286_s13, 0  ;;  %s1475_s5 = sld [smem:[#allocation11_spill]] }
  0x11   : > { %p1314_p10 = pnand %p935_p7, %p254_p8  ;;  %s1206_s25 = smov [#allocation2]  }
  0x12   : > { %s276_s26 = sshll.u32 %s1206_s25, 4  ;;  %s1476_s7 = sld [smem:[#allocation12_spill]]  ;;  %s277_s26 = int_to_ptr.vmem [resolvable:$true] %s276_s26 }
  0x13   : > { %p1006_p11 = pneg %p1314_p10  ;;  %s1207_s14 = smov 256  }
  0x14   : > { %s1208_s16 = smov 16   ;;  %s1209_s17 = smov [#allocation5]  }
  0x15   : > { %p1007_p12 = pnand %p1017_p9, %p1006_p11  ;;  %s293_s22 = sshll.u32 %s1209_s17, 4  ;;  %s294_s22 = int_to_ptr.vmem [resolvable:$true] %s293_s22 }
  0x16   : > { %s274_s24 = sshll.u32 %s1475_s5, 4  ;;  %s1210_s23 = smov 128   ;;  %s275_s24 = int_to_ptr.hbm [resolvable:$true] %s274_s24 }
  0x17   : > { %1009 = dma.hbm_to_vmem [thread:$0]  (!%p1007_p12), %s275_s24, 8192, %s277_s26, [#allocation3], %s1207_s14, %s1207_s14, %s1208_s16  }
  0x18   : > { %s291_s29 = sshll.u32 %s1476_s7, 4  ;;  %s1211_s5 = smov 8   ;;  %s292_s29 = int_to_ptr.hbm [resolvable:$true] %s291_s29 }
  0x19   : > { %1012 = dma.hbm_to_vmem [thread:$0]  (!%p1007_p12), %s292_s29, 4096, %s294_s22, [#allocation6], %s1210_s23, %s1210_s23, %s1211_s5  }
  0x1a   : > { %346 = sbr.rel (%p1314_p10) target bundleno = 493 (0x1ed), region = 56 }
  0x1f   : > { %1179 = dma.done.wait (%p1017_p9), [#allocation3], 8192  }
  0x20   : > { %1181 = vsyncadd (%p1017_p9), [#allocation3], 4294959104 }
  0x21   : > { %1183 = dma.done.wait (%p1017_p9), [#allocation6], 4096  }
  0x22   : > { %1185 = vsyncadd (%p1017_p9), [#allocation6], 4294963200  ;;  %s1339_s24 = sshll.u32 %s1286_s13, 1  ;;  %v438_v0 = vld [vmem:[%s1461_s2 + $0x10] sm:$0xff]  ;;  %v436_v1 = vld [vmem:[%s1461_s2] sm:$0xff]  ;;  %vm446_vm0 = vcmask 130048  }
  0x23   : > { %p406_p13 = scmp.lt.s32.totalorder %s1339_s24, 2  ;;  %v439_v2 = vld [vmem:[%s1461_s2 + $0x18] sm:$0xff]  ;;  %519 = vmatpush.msra.mxu2 %v438_v0  ;;  %v437_v4 = vld [vmem:[%s1461_s2 + $0x8] sm:$0xff]  ;;  %v444_v5 = vld [vmem:[%s1462_s3 + $0x10] sm:$0xff]  ;;  %s398_s26 = sand.u32 1, %s1196_s10  }
  0x24   : > { %542 = vmatpush.msra.mxu3 %v439_v2  ;;  %467 = vmatpush.msra.mxu0 %v444_v5  ;;  %v442_v6 = vld [vmem:[%s1462_s3] sm:$0xff]  ;;  %v445_v7 = vld [vmem:[%s1462_s3 + $0x18] sm:$0xff]  ;;  %v443_v9 = vld [vmem:[%s1462_s3 + $0x8] sm:$0xff]  ;;  %s942_s14 = sshll.u32 %s398_s26, 4  ;;  %s824_s17 = ssub.s32 (%p1303_p5), 3, %s1339_s24 }
  0x25   : > { %s407_s5 = scalar_select %p406_p13, %s1339_s24, 2  ;;  %520 = vmatpush.msra.mxu2 %v436_v1  ;;  %v595_v10 = vld [vmem:[#allocation2 + $0xf0] sm:$0xff]  ;;  %v596_v11 = vld [vmem:[#allocation2 + $0xf8] sm:$0xff]  ;;  %490 = vmatpush.msra.mxu1 %v445_v7  ;;  %v594_v12 = vld [vmem:[#allocation2 + $0xe8] sm:$0xff] }
  0x26   : > { %543 = vmatpush.msra.mxu3 %v437_v4  ;;  %468 = vmatpush.msra.mxu0 %v442_v6  ;;  %v593_v13 = vld [vmem:[#allocation2 + $0xe0] sm:$0xff]  ;;  %v627_v14 = vld [vmem:[#allocation2 + $0x1f0] sm:$0xff]  ;;  %v628_v15 = vld [vmem:[#allocation2 + $0x1f8] sm:$0xff]  ;;  %s400_s16 = scalar_lea.vmem [#allocation7], %s942_s14  ;;  %p825_p0 = scmp.lt.s32.totalorder (%p1303_p5), %s824_s17, 2 }
  0x27   : > { %s944_s21 = sshll.u32 %s407_s5, 3  ;;  %681 = vmatpush.msrb.mxu2 %v596_v11  ;;  %491 = vmatpush.msra.mxu1 %v443_v9  ;;  %v592_v16 = vld [vmem:[#allocation2 + $0xd8] sm:$0xff]  ;;  %v591_v17 = vld [vmem:[#allocation2 + $0xd0] sm:$0xff]  ;;  %v625_v18 = vld [vmem:[#allocation2 + $0x1e0] sm:$0xff] }
  0x28   : > { %s1346_s27 = scalar_lea.vmem %s1459_s0, %s944_s21  ;;  %s1360_s7 = scalar_lea.vmem %s1460_s1, %s944_s21  ;;  %635 = vmatpush.msrb.mxu0 %v595_v10  ;;  %704 = vmatpush.msrb.mxu3 %v628_v15  ;;  %v626_v20 = vld [vmem:[#allocation2 + $0x1e8] sm:$0xff]  ;;  %v589_v21 = vld [vmem:[#allocation2 + $0xc0] sm:$0xff]  ;;  %v623_v23 = vld [vmem:[#allocation2 + $0x1d0] sm:$0xff] }
  0x29   : > { %v434_v3 = vld [vmem:[%s1346_s27] sm:$0xff]  ;;  %682 = vmatpush.msrb.mxu2 %v594_v12  ;;  %v435_v19 = vld [vmem:[%s1346_s27 + $0x8] sm:$0xff]  ;;  %658 = vmatpush.msrb.mxu1 %v627_v14  ;;  %v624_v25 = vld [vmem:[#allocation2 + $0x1d8] sm:$0xff]  ;;  %s1399_s21 = scalar_lea.sflag [#allocation4], %s398_s26 }
  0x2a   : > { %v440_v8 = vld [vmem:[%s1360_s7] sm:$0xff]  ;;  %951 = vmatmul.msk.f32.vlgmr.msra.gmra.mxu2 %vm446_vm0, %v434_v3  ;;  %953 = vmatmul.msk.f32.vlgmr.msra.gmra.mxu3 %vm446_vm0, %v434_v3  ;;  %v441_v22 = vld [vmem:[%s1360_s7 + $0x8] sm:$0xff]  ;;  %v587_v26 = vld [vmem:[#allocation2 + $0xb0] sm:$0xff] }
  0x2b   : > { %947 = vmatmul.msk.f32.vlgmr.msra.gmra.mxu0 %vm446_vm0, %v440_v8  ;;  %949 = vmatmul.msk.f32.vlgmr.msra.gmra.mxu1 %vm446_vm0, %v440_v8  ;;  %v590_v24 = vld [vmem:[#allocation2 + $0xc8] sm:$0xff]  ;;  %v621_v27 = vld [vmem:[#allocation2 + $0x1c0] sm:$0xff]  ;;  %v588_v28 = vld [vmem:[#allocation2 + $0xb8] sm:$0xff] }
  0x2c   : > { %636 = vmatpush.msrb.mxu0 %v593_v13  ;;  %683 = vmatpush.msrb.mxu2 %v592_v16  ;;  %v622_v29 = vld [vmem:[#allocation2 + $0x1c8] sm:$0xff]  ;;  %v585_v30 = vld [vmem:[#allocation2 + $0xa0] sm:$0xff]  ;;  %v619_v31 = vld [vmem:[#allocation2 + $0x1b0] sm:$0xff] }
  0x2d   : > { %659 = vmatpush.msrb.mxu1 %v625_v18  ;;  %705 = vmatpush.msrb.mxu3 %v626_v20  ;;  %v586_v32 = vld [vmem:[#allocation2 + $0xa8] sm:$0xff]  ;;  %v620_v33 = vld [vmem:[#allocation2 + $0x1b8] sm:$0xff]  ;;  %v583_v34 = vld [vmem:[#allocation2 + $0x90] sm:$0xff] }
  0x2e   : > { %637 = vmatpush.msrb.mxu0 %v591_v17  ;;  %684 = vmatpush.msrb.mxu2 %v590_v24  ;;  %v617_v35 = vld [vmem:[#allocation2 + $0x1a0] sm:$0xff]  ;;  %v584_v36 = vld [vmem:[#allocation2 + $0x98] sm:$0xff]  ;;  %v618_v37 = vld [vmem:[#allocation2 + $0x1a8] sm:$0xff] }
  0x2f   : > { %660 = vmatpush.msrb.mxu1 %v623_v23  ;;  %706 = vmatpush.msrb.mxu3 %v624_v25  ;;  %v581_v38 = vld [vmem:[#allocation2 + $0x80] sm:$0xff]  ;;  %v615_v39 = vld [vmem:[#allocation2 + $0x190] sm:$0xff]  ;;  %v582_v40 = vld [vmem:[#allocation2 + $0x88] sm:$0xff] }
  0x30   : > { %638 = vmatpush.msrb.mxu0 %v589_v21  ;;  %685 = vmatpush.msrb.mxu2 %v588_v28  ;;  %v616_v41 = vld [vmem:[#allocation2 + $0x198] sm:$0xff]  ;;  %v579_v42 = vld [vmem:[#allocation2 + $0x70] sm:$0xff]  ;;  %v613_v43 = vld [vmem:[#allocation2 + $0x180] sm:$0xff] }
  0x31   : > { %661 = vmatpush.msrb.mxu1 %v621_v27  ;;  %707 = vmatpush.msrb.mxu3 %v622_v29  ;;  %v580_v44 = vld [vmem:[#allocation2 + $0x78] sm:$0xff]  ;;  %v614_v45 = vld [vmem:[#allocation2 + $0x188] sm:$0xff]  ;;  %v577_v46 = vld [vmem:[#allocation2 + $0x60] sm:$0xff] }
  0x32   : > { %952 = vmatmul.msk.f32.gmra.mxu2 %vm446_vm0, %v435_v19  ;;  %954 = vmatmul.msk.f32.gmra.mxu3 %vm446_vm0, %v435_v19  ;;  %v611_v47 = vld [vmem:[#allocation2 + $0x170] sm:$0xff]  ;;  %v578_v48 = vld [vmem:[#allocation2 + $0x68] sm:$0xff]  ;;  %v612_v49 = vld [vmem:[#allocation2 + $0x178] sm:$0xff] }
  0x33   : > { %948 = vmatmul.msk.f32.gmra.mxu0 %vm446_vm0, %v441_v22  ;;  %950 = vmatmul.msk.f32.gmra.mxu1 %vm446_vm0, %v441_v22  ;;  %v575_v50 = vld [vmem:[#allocation2 + $0x50] sm:$0xff]  ;;  %v609_v51 = vld [vmem:[#allocation2 + $0x160] sm:$0xff]  ;;  %v576_v52 = vld [vmem:[#allocation2 + $0x58] sm:$0xff] }
  0x34   : > { %639 = vmatpush.msrb.mxu0 %v587_v26  ;;  %662 = vmatpush.msrb.mxu1 %v619_v31  ;;  %v610_v53 = vld [vmem:[#allocation2 + $0x168] sm:$0xff]  ;;  %v573_v54 = vld [vmem:[#allocation2 + $0x40] sm:$0xff]  ;;  %v607_v55 = vld [vmem:[#allocation2 + $0x150] sm:$0xff] }
  0x35   : > { %686 = vmatpush.msrb.mxu2 %v586_v32  ;;  %708 = vmatpush.msrb.mxu3 %v620_v33  ;;  %v574_v56 = vld [vmem:[#allocation2 + $0x48] sm:$0xff]  ;;  %v608_v57 = vld [vmem:[#allocation2 + $0x158] sm:$0xff]  ;;  %v571_v58 = vld [vmem:[#allocation2 + $0x30] sm:$0xff] }
  0x36   : > { %640 = vmatpush.msrb.mxu0 %v585_v30  ;;  %663 = vmatpush.msrb.mxu1 %v617_v35  ;;  %v605_v59 = vld [vmem:[#allocation2 + $0x140] sm:$0xff]  ;;  %v572_v60 = vld [vmem:[#allocation2 + $0x38] sm:$0xff]  ;;  %v606_v61 = vld [vmem:[#allocation2 + $0x148] sm:$0xff] }
  0x37   : > { %687 = vmatpush.msrb.mxu2 %v584_v36  ;;  %709 = vmatpush.msrb.mxu3 %v618_v37  ;;  %v569_v62 = vld [vmem:[#allocation2 + $0x20] sm:$0xff]  ;;  %v603_v63 = vld [vmem:[#allocation2 + $0x130] sm:$0xff]  ;;  %v570_v0 = vld [vmem:[#allocation2 + $0x28] sm:$0xff] }
  0x38   : > { %641 = vmatpush.msrb.mxu0 %v583_v34  ;;  %664 = vmatpush.msrb.mxu1 %v615_v39  ;;  %v604_v1 = vld [vmem:[#allocation2 + $0x138] sm:$0xff]  ;;  %v567_v2 = vld [vmem:[#allocation2 + $0x10] sm:$0xff]  ;;  %v601_v3 = vld [vmem:[#allocation2 + $0x120] sm:$0xff] }
  0x39   : > { %688 = vmatpush.msrb.mxu2 %v582_v40  ;;  %710 = vmatpush.msrb.mxu3 %v616_v41  ;;  %v568_v4 = vld [vmem:[#allocation2 + $0x18] sm:$0xff]  ;;  %v602_v5 = vld [vmem:[#allocation2 + $0x128] sm:$0xff]  ;;  %v565_v6 = vld [vmem:[#allocation2] sm:$0xff] }
  0x3a   : > { %642 = vmatpush.msrb.mxu0 %v581_v38  ;;  %665 = vmatpush.msrb.mxu1 %v613_v43  ;;  %v599_v7 = vld [vmem:[#allocation2 + $0x110] sm:$0xff]  ;;  %v566_v8 = vld [vmem:[#allocation2 + $0x8] sm:$0xff]  ;;  %v600_v9 = vld [vmem:[#allocation2 + $0x118] sm:$0xff] }
  0x3b   : > { %689 = vmatpush.msrb.mxu2 %v580_v44  ;;  %711 = vmatpush.msrb.mxu3 %v614_v45  ;;  %v597_v10 = vld [vmem:[#allocation2 + $0x100] sm:$0xff]  ;;  %v598_v11 = vld [vmem:[#allocation2 + $0x108] sm:$0xff]  ;;  %v746_v12 = vld [vmem:[#allocation5 + $0x78] sm:$0xff] }
  0x3c   : > { %643 = vmatpush.msrb.mxu0 %v579_v42  ;;  %666 = vmatpush.msrb.mxu1 %v611_v47  ;;  %v745_v13 = vld [vmem:[#allocation5 + $0x70] sm:$0xff]  ;;  %v762_v14 = vld [vmem:[#allocation5 + $0xf8] sm:$0xff]  ;;  %v744_v15 = vld [vmem:[#allocation5 + $0x68] sm:$0xff] }
  0x3d   : > { %690 = vmatpush.msrb.mxu2 %v578_v48  ;;  %712 = vmatpush.msrb.mxu3 %v612_v49  ;;  %v761_v16 = vld [vmem:[#allocation5 + $0xf0] sm:$0xff]  ;;  %v760_v17 = vld [vmem:[#allocation5 + $0xe8] sm:$0xff]  ;;  %v743_v18 = vld [vmem:[#allocation5 + $0x60] sm:$0xff] }
  0x3e   : > { %644 = vmatpush.msrb.mxu0 %v577_v46  ;;  %667 = vmatpush.msrb.mxu1 %v609_v51  ;;  %v759_v19 = vld [vmem:[#allocation5 + $0xe0] sm:$0xff]  ;;  %v742_v20 = vld [vmem:[#allocation5 + $0x58] sm:$0xff]  ;;  %v741_v22 = vld [vmem:[#allocation5 + $0x50] sm:$0xff] }
  0x3f   : > { %691 = vmatpush.msrb.mxu2 %v576_v52  ;;  %713 = vmatpush.msrb.mxu3 %v610_v53  ;;  %v758_v21 = vld [vmem:[#allocation5 + $0xd8] sm:$0xff]  ;;  %v757_v23 = vld [vmem:[#allocation5 + $0xd0] sm:$0xff]  ;;  %v740_v24 = vld [vmem:[#allocation5 + $0x48] sm:$0xff] }
  0x40   : > { %645 = vmatpush.msrb.mxu0 %v575_v50  ;;  %668 = vmatpush.msrb.mxu1 %v607_v55  ;;  %v756_v25 = vld [vmem:[#allocation5 + $0xc8] sm:$0xff]  ;;  %v551_v27 = vld [vmem:[%s1463_s4] sm:$0x3]  ;;  %v738_v31 = vld [vmem:[#allocation5 + $0x38] sm:$0xff] }
  0x41   : > { %692 = vmatpush.msrb.mxu2 %v574_v56  ;;  %714 = vmatpush.msrb.mxu3 %v608_v57  ;;  %v739_v28 = vld [vmem:[#allocation5 + $0x40] sm:$0xff]  ;;  %v553_v32 = vperm.slane %v551_v27, 0  ;;  %v554_v33 = vperm.slane %v551_v27, 1  ;;  %v754_v34 = vld [vmem:[#allocation5 + $0xb8] sm:$0xff]  ;;  %v737_v37 = vld [vmem:[#allocation5 + $0x30] sm:$0xff] }
  0x42   : > { %646 = vmatpush.msrb.mxu0 %v573_v54  ;;  %669 = vmatpush.msrb.mxu1 %v605_v59  ;;  %v755_v29 = vld [vmem:[#allocation5 + $0xc0] sm:$0xff]  ;;  %v736_v40 = vld [vmem:[#allocation5 + $0x28] sm:$0xff]  ;;  %v734_v56 = vld [vmem:[#allocation5 + $0x18] sm:$0xff] }
  0x43   : > { %693 = vmatpush.msrb.mxu2 %v572_v60  ;;  %715 = vmatpush.msrb.mxu3 %v606_v61  ;;  %v735_v47 = vld [vmem:[#allocation5 + $0x20] sm:$0xff]  ;;  %v753_v57 = vld [vmem:[#allocation5 + $0xb0] sm:$0xff]  ;;  %v752_v59 = vld [vmem:[#allocation5 + $0xa8] sm:$0xff] }
  0x44   : > { %647 = vmatpush.msrb.mxu0 %v571_v58  ;;  %670 = vmatpush.msrb.mxu1 %v603_v63  ;;  %v733_v58 = vld [vmem:[#allocation5 + $0x10] sm:$0xff]  ;;  %v732_v60 = vld [vmem:[#allocation5 + $0x8] sm:$0xff]  ;;  %v751_v61 = vld [vmem:[#allocation5 + $0xa0] sm:$0xff] }
  0x45   : > { %694 = vmatpush.msrb.mxu2 %v570_v0  ;;  %716 = vmatpush.msrb.mxu3 %v604_v1  ;;  %v750_v63 = vld [vmem:[#allocation5 + $0x98] sm:$0xff]  ;;  %v749_v0 = vld [vmem:[#allocation5 + $0x90] sm:$0xff]  ;;  %v748_v1 = vld [vmem:[#allocation5 + $0x88] sm:$0xff] }
  0x46   : > { %648 = vmatpush.msrb.mxu0 %v569_v62  ;;  %671 = vmatpush.msrb.mxu1 %v601_v3  ;;  %v731_v62 = vld [vmem:[#allocation5] sm:$0xff] }
  0x47   : > { %695 = vmatpush.msrb.mxu2 %v568_v4  ;;  %717 = vmatpush.msrb.mxu3 %v602_v5  ;;  %v629_v3 = vld [vmem:[%s1465_s6] sm:$0x3] }
  0x48   : > { %649 = vmatpush.msrb.mxu0 %v567_v2  ;;  %672 = vmatpush.msrb.mxu1 %v599_v7  ;;  %v747_v2 = vld [vmem:[#allocation5 + $0x80] sm:$0xff]  ;;  %v631_v4 = vperm.slane %v629_v3, 0 }
  0x49   : > { %696 = vmatpush.msrb.mxu2 %v566_v8  ;;  %718 = vmatpush.msrb.mxu3 %v600_v9  ;;  %v632_v9 = vperm.slane %v629_v3, 1 }
  0x4a   : > { %650 = vmatpush.msrb.mxu0 %v565_v6  ;;  %673 = vmatpush.msrb.mxu1 %v597_v10 }
  0x4b   : > { %719 = vmatpush.msrb.mxu3 %v598_v11  ;;  %965 = vmatpush.msra.mxu2 %v746_v12 }
  0x4c   : > { %767 = vmatpush.msra.mxu0 %v746_v12  ;;  %790 = vmatpush.msra.mxu1 %v762_v14 }
  0x4d   : > { %981 = vmatpush.msra.mxu3 %v762_v14  ;;  %966 = vmatpush.msra.mxu2 %v745_v13 }
  0x4e   : > { %768 = vmatpush.msra.mxu0 %v745_v13  ;;  %791 = vmatpush.msra.mxu1 %v761_v16 }
  0x4f   : > { %982 = vmatpush.msra.mxu3 %v761_v16  ;;  %967 = vmatpush.msra.mxu2 %v744_v15 }
  0x50   : > { %769 = vmatpush.msra.mxu0 %v744_v15  ;;  %792 = vmatpush.msra.mxu1 %v760_v17 }
  0x51   : > { %983 = vmatpush.msra.mxu3 %v760_v17  ;;  %968 = vmatpush.msra.mxu2 %v743_v18 }
  0x52   : > { %770 = vmatpush.msra.mxu0 %v743_v18  ;;  %793 = vmatpush.msra.mxu1 %v759_v19 }
  0x53   : > { %984 = vmatpush.msra.mxu3 %v759_v19  ;;  %969 = vmatpush.msra.mxu2 %v742_v20 }
  0x54   : > { %771 = vmatpush.msra.mxu0 %v742_v20  ;;  %794 = vmatpush.msra.mxu1 %v758_v21 }
  0x55   : > { %985 = vmatpush.msra.mxu3 %v758_v21  ;;  %970 = vmatpush.msra.mxu2 %v741_v22 }
  0x56   : > { %772 = vmatpush.msra.mxu0 %v741_v22  ;;  %795 = vmatpush.msra.mxu1 %v757_v23 }
  0x57   : > { %986 = vmatpush.msra.mxu3 %v757_v23  ;;  %971 = vmatpush.msra.mxu2 %v740_v24 }
  0x58   : > { %773 = vmatpush.msra.mxu0 %v740_v24  ;;  %796 = vmatpush.msra.mxu1 %v756_v25 }
  0x59   : > { %987 = vmatpush.msra.mxu3 %v756_v25  ;;  %972 = vmatpush.msra.mxu2 %v739_v28 }
  0x5a   : > { %774 = vmatpush.msra.mxu0 %v739_v28  ;;  %797 = vmatpush.msra.mxu1 %v755_v29 }
  0x5b   : > { %988 = vmatpush.msra.mxu3 %v755_v29  ;;  %973 = vmatpush.msra.mxu2 %v738_v31 }
  0x5c   : > { %775 = vmatpush.msra.mxu0 %v738_v31  ;;  %798 = vmatpush.msra.mxu1 %v754_v34 }
  0x5d   : > { %989 = vmatpush.msra.mxu3 %v754_v34  ;;  %974 = vmatpush.msra.mxu2 %v737_v37 }
  0x5e   : > { %776 = vmatpush.msra.mxu0 %v737_v37  ;;  %799 = vmatpush.msra.mxu1 %v753_v57 }
  0x5f   : > { %975 = vmatpush.msra.mxu2 %v736_v40  ;;  %990 = vmatpush.msra.mxu3 %v753_v57 }
  0x60   : > { %777 = vmatpush.msra.mxu0 %v736_v40  ;;  %800 = vmatpush.msra.mxu1 %v752_v59 }
  0x61   : > { %976 = vmatpush.msra.mxu2 %v735_v47  ;;  %991 = vmatpush.msra.mxu3 %v752_v59 }
  0x62   : > { %778 = vmatpush.msra.mxu0 %v735_v47  ;;  %801 = vmatpush.msra.mxu1 %v751_v61 }
  0x63   : > { %977 = vmatpush.msra.mxu2 %v734_v56  ;;  %992 = vmatpush.msra.mxu3 %v751_v61 }
  0x64   : > { %779 = vmatpush.msra.mxu0 %v734_v56  ;;  %802 = vmatpush.msra.mxu1 %v750_v63 }
  0x65   : > { %978 = vmatpush.msra.mxu2 %v733_v58  ;;  %993 = vmatpush.msra.mxu3 %v750_v63 }
  0x66   : > { %780 = vmatpush.msra.mxu0 %v733_v58  ;;  %803 = vmatpush.msra.mxu1 %v749_v0 }
  0x67   : > { %979 = vmatpush.msra.mxu2 %v732_v60  ;;  %994 = vmatpush.msra.mxu3 %v749_v0 }
  0x68   : > { %781 = vmatpush.msra.mxu0 %v732_v60  ;;  %804 = vmatpush.msra.mxu1 %v748_v1 }
  0x69   : > { %980 = vmatpush.msra.mxu2 %v731_v62  ;;  %995 = vmatpush.msra.mxu3 %v748_v1 }
  0x6a   : > { %782 = vmatpush.msra.mxu0 %v731_v62  ;;  %805 = vmatpush.msra.mxu1 %v747_v2 }
  0x6b   : > { %996 = vmatpush.msra.mxu3 %v747_v2 }
  0xa8   : > { %v470_v26 = vpop.f32.mrf.mxu0  ;;  %v493_v30 = vpop.f32.mrf.mxu1 }
  0xad   : > { %v522_v35 = vpop.f32.mrf.mxu2  ;;  %v545_v36 = vpop.f32.mrf.mxu3 }
  0xae   : > { %v523_v38 = vadd.f32 %v522_v35, %v470_v26  ;;  %v546_v39 = vadd.f32 %v545_v36, %v493_v30  ;;  %v1062_v26 = vld [vmem:[%s1467_s8] ss:$0 sm:$0xff] }
  0xb0   : > { %v557_v41 = vadd.f32 %v553_v32, %v523_v38  ;;  %v558_v42 = vadd.f32 %v554_v33, %v546_v39  ;;  %v473_v45 = vpop.f32.mrf.mxu0  ;;  %v496_v46 = vpop.f32.mrf.mxu1 }
  0xb2   : > { %v561_v43 = vmax.f32 %v557_v41, 0.0  ;;  %v562_v44 = vmax.f32 %v558_v42, 0.0 }
  0xb4   : > { %651 = vmatmul.f32.vlgmr.msrb.gmra.mxu0 %v561_v43  ;;  %697 = vmatmul.f32.vlgmr.msrb.gmra.mxu2 %v561_v43 }
  0xb5   : > { %v525_v48 = vpop.f32.mrf.mxu2  ;;  %674 = vmatmul.f32.vlgmr.msrb.gmra.mxu1 %v562_v44  ;;  %720 = vmatmul.f32.vlgmr.msrb.gmra.mxu3 %v562_v44  ;;  %v548_v49 = vpop.f32.mrf.mxu3 }
  0xb6   : > { %v526_v50 = vadd.f32 %v525_v48, %v473_v45  ;;  %v549_v51 = vadd.f32 %v548_v49, %v496_v46 }
  0xb8   : > { %v559_v52 = vadd.f32 %v553_v32, %v526_v50  ;;  %v560_v53 = vadd.f32 %v554_v33, %v549_v51 }
  0xba   : > { %v563_v54 = vmax.f32 %v559_v52, 0.0  ;;  %v564_v55 = vmax.f32 %v560_v53, 0.0 }
  0xbc   : > { %654 = vmatmul.f32.gmra.mxu0 %v563_v54  ;;  %700 = vmatmul.f32.gmra.mxu2 %v563_v54 }
  0xbd   : > { %677 = vmatmul.f32.gmra.mxu1 %v564_v55  ;;  %723 = vmatmul.f32.gmra.mxu3 %v564_v55 }
 0x131   : > { %v652_v5 = vpop.f32.mrf.mxu0 }
 0x132   : > { %v653_v6 = vadd.f32 %v652_v5, %v631_v4  ;;  %v675_v7 = vpop.f32.mrf.mxu1 }
 0x134   : > { %v676_v8 = vadd.f32 %v675_v7, %v653_v6 }
 0x136   : > { %v727_v10 = vmax.f32 %v676_v8, 0.0 }
 0x137   : > { %v698_v11 = vpop.f32.mrf.mxu2 }
 0x138   : > { %v699_v12 = vadd.f32 %v698_v11, %v632_v9  ;;  %783 = vmatmul.f32.vlgmr.msra.gmra.mxu0 %v727_v10  ;;  %v721_v13 = vpop.f32.mrf.mxu3 }
 0x139   : > { %v655_v14 = vpop.f32.mrf.mxu0 }
 0x13a   : > { %v656_v15 = vadd.f32 %v655_v14, %v631_v4  ;;  %v722_v16 = vadd.f32 %v721_v13, %v699_v12  ;;  %v678_v17 = vpop.f32.mrf.mxu1 }
 0x13c   : > { %v728_v18 = vmax.f32 %v722_v16, 0.0  ;;  %v679_v19 = vadd.f32 %v678_v17, %v656_v15 }
 0x13e   : > { %v729_v20 = vmax.f32 %v679_v19, 0.0  ;;  %806 = vmatmul.f32.vlgmr.msra.gmra.mxu1 %v728_v18 }
 0x13f   : > { %v701_v21 = vpop.f32.mrf.mxu2 }
 0x140   : > { %v702_v22 = vadd.f32 %v701_v21, %v632_v9  ;;  %786 = vmatmul.f32.vlgmr.msra.gmra.mxu2 %v729_v20  ;;  %v724_v23 = vpop.f32.mrf.mxu3 }
 0x142   : > { %v725_v24 = vadd.f32 %v724_v23, %v702_v22 }
 0x144   : > { %v730_v25 = vmax.f32 %v725_v24, 0.0 }
 0x146   : > { %809 = vmatmul.f32.vlgmr.msra.gmra.mxu3 %v730_v25 }
 0x1b5   : > { %v784_v27 = vpop.f32.mrf.mxu0 }
 0x1b6   : > { %v785_v28 = vadd.f32 %v1062_v26, %v784_v27 }
 0x1bb   : > { %v807_v29 = vpop.f32.mrf.mxu1 }
 0x1bc   : > { %v808_v30 = vadd.f32 %v807_v29, %v785_v28 }
 0x1be   : > { %813 = vst [vmem:[%s400_s16] sm:$0xff] %v808_v30 }
 0x1c3   : > { %v787_v31 = vpop.f32.mrf.mxu2 }
 0x1c4   : > { %v788_v32 = vadd.f32 %v1062_v26, %v787_v31 }
 0x1c8   : > { %822 = sbr.rel (!%p1303_p5) target bundleno = 493 (0x1ed), region = 68 }
 0x1c9   : > { %v810_v33 = vpop.f32.mrf.mxu3 }
 0x1ca   : > { %v811_v34 = vadd.f32 %v810_v33, %v788_v32 }
 0x1cc   : > { %814 = vst [vmem:[%s400_s16 + $0x8] sm:$0xff] %v811_v34 }
 0x1cd   : > { %s1484_s17 = smov (!%p825_p0, %s824_s17), 2 }
 0x1ce   : > { %s957_s22 = sshll.u32 %s1484_s17, 3 }
 0x1cf   : > { %s828_s23 = ssub.s32 16, %s957_s22 }
 0x1d0   : > { %s829_s7 = sshll.u32 %s828_s23, 4 }
 0x1d1   : > { %830 = vsyncadd %s1399_s21, %s829_s7  ;;  %p1408_p1 = scmp.ne.s32.totalorder %s957_s22, 0  ;;  %s964_s19 = sshll.u32 %s1286_s13, 4 }
 0x1d2   : > { %s833_s24 = scalar_lea.hbm %s1468_s9, %s964_s19  ;;  %s835_s26 = sshll.u32 %s400_s16, 4  ;;  %s1416_s26 = int_to_ptr.vmem [resolvable:$true] %s835_s26 }
 0x1d3   : > { %s837_s28 = sshll.u32 %s833_s24, 4  ;;  %s1469_s29 = sshll.u32 %s1484_s17, 7  ;;  %s1418_s28 = int_to_ptr.hbm [resolvable:$true] %s837_s28 }
 0x1d4   : > { %s1123_s14 = sshra.s32 %s1416_s26, 4  ;;  %s1125_s22 = sshrl.u32 %s1469_s29, 4  ;;  %s1124_s14 = int_to_ptr.vmem [resolvable:$true] %s1123_s14 }
 0x1d5   : > { %s1130_s23 = scalar_lea.vmem %s1124_s14, %s1125_s22  ;;  %s1212_s13 = smov [#allocation7]  }
 0x1d6   : > { %p1131_p2 = scmp.ne.s32.totalorder %s1124_s14, %s1130_s23  ;;  %s1134_s7 = scalar_lea.vmem %s1212_s13, 32 }
 0x1d7   : > { %p1136_p5 = scmp.lt.s32.totalorder %s1134_s7, %s1130_s23 }
 0x1d8   : > { %p1132_p3 = pnand %p1131_p2, %p1408_p1 }
 0x1da   : > { %p1133_p4 = pneg %p1132_p3 }
 0x1dc   : > { %p1138_p7 = pnand %p1136_p5, %p1133_p4 }
 0x1de   : > { %1141 = shalt.err (!%p1138_p7)
}
 0x1df   : > { %s1142_s16 = sshra.s32 %s1418_s28, 4  ;;  %s1153_s24 = scalar_lea.hbm %s1468_s9, 24  ;;  %s1143_s16 = int_to_ptr.hbm [resolvable:$true] %s1142_s16 }
 0x1e0   : > { %s1149_s19 = scalar_lea.hbm %s1143_s16, %s1125_s22  ;;  %p1154_p11 = scmp.lt.s32.totalorder %s1143_s16, %s1468_s9 }
 0x1e1   : > { %p1150_p8 = scmp.ne.s32.totalorder %s1143_s16, %s1149_s19  ;;  %p1155_p12 = scmp.lt.s32.totalorder %s1153_s24, %s1149_s19 }
 0x1e3   : > { %p1151_p9 = pnand %p1150_p8, %p1408_p1  ;;  %p1156_p13 = por %p1155_p12, %p1154_p11 }
 0x1e5   : > { %p1152_p10 = pneg %p1151_p9 }
 0x1e7   : > { %p1157_p0 = pnand %p1156_p13, %p1152_p10 }
 0x1e9   : > { %1160 = shalt.err (!%p1157_p0)
}
 0x1ea   : > { %s1213_s23 = smov 128   ;;  %s1214_s22 = smov 8  }
 0x1eb   : > { %s1478_s13 = sshll.u32 %s1484_s17, 7 }
 0x1ec   : > { %843 = dma.vmem_to_hbm [thread:$0]  (%p1408_p1), %s1416_s26, %s1478_s13, %s1418_s28, %s1399_s21, %s1213_s23, %s1213_s23, %s1214_s22  }
 0x1ed PF: > { %p1021_p2 = scmp.ge.s32.totalorder %s1204_s12, 2  ;;  %s852_s29 = sand.u32 1, %s1192_s30  }
 0x1ee   : > { %s853_s7 = scalar_lea.sflag [#allocation4], %s852_s29 }
 0x1ef   : > { %p1014_p3 = pnand %p1021_p2, %p1307_p6 }
 0x1f1   : > { %p1015_p4 = pneg %p1014_p3 }
 0x1f3   : > { %1187 = dma.done.wait (%p1015_p4), %s853_s7, 256  }
 0x1f4   : > { %1189 = vsyncadd (%p1015_p4), %s853_s7, 4294967040  ;;  %p21_p5 = scmp.ge.s32.totalorder %s1290_s15, 4   ;;  %s1479_s30 = smov %s1196_s10 }
 0x1f5   : > { %s1480_s10 = smov %s1200_s11  ;;  %s1481_s11 = smov %s1301_s18 }
 0x1f6   : > { %s1482_s12 = smov %s1290_s15  ;;  %23 = sbr.rel (!%p21_p5) target bundleno = 8 (0x8), region = 103 }
 0x1fb   :  { %859 = vsyncpa [#allocation3], 1 }
 0x1fc   :  { %861 = vsyncpa [#allocation3 + $0x1], 1 }
 0x1fd   :  { %862 = vsyncpa [#allocation6], 1 }
 0x1fe   :  { %863 = vsyncpa [#allocation4], 1 }
 0x1ff   :  { %865 = vsyncpa [#allocation4 + $0x1], 1 }

</bundles_post_ra>
